<compile_context>
chip_gen: v6e
topology: v6e:2x2x1
jax: 0.10.0
libtpu: 0.0.40
codegen_flags: <defaults>
</compile_context>

<pallas_src>
import jax
import jax.numpy as jnp
from jax import lax
from jax.experimental import pallas as pl
from jax.experimental.pallas import tpu as pltpu


def _silu(h):
    # silu(h) = h * sigmoid(h) = 0.5*h*(1 + tanh(h/2)); tanh is a single native EUP op.
    return h * (0.5 * jnp.tanh(0.5 * h) + 0.5)


def _make_kernel(n_layers, dim, bs, tile_bs):
    ragged = (bs % tile_bs) != 0

    def kernel(x_ref, t_ref, *rest):
        w_refs, out_ref = rest[:-1], rest[-1]

        x = x_ref[...]          # (TB, dim) f32, row-major straight from HBM
        t = t_ref[...]          # (TB, 1)   f32

        if ragged:
            # Mask out-of-range rows of the last (padded) block: keeps 1/(1-t) and the MLP
            # finite in the (discarded) tail rows.  Statically removed when bs % TB == 0.
            rows = (pl.program_id(0) * tile_bs
                    + lax.broadcasted_iota(jnp.int32, (tile_bs, 1), 0))
            valid = rows < bs
            t = jnp.where(valid, t, 0.0)
            x = jnp.where(valid, x, 0.0)

        # Relayout to lane-dense (features, batch): one XLU transpose (idle slot).
        xt1 = jnp.concatenate([x, t, jnp.ones_like(t)], axis=-1)   # (TB, dim+2)
        xt1_t = jnp.transpose(xt1)                                 # (dim+2, TB)

        # --- MLPVectorField: Linear/SiLU stack, activations kept (features, TB) ---
        # Layer 0: packed [W_x | w_t | b] -> t-column and bias ride the MXU (ones column).
        h = jnp.dot(w_refs[0][...], xt1_t, preferred_element_type=jnp.float32)
        for li in range(1, n_layers):
            h = _silu(h)
            w_ref = w_refs[li]                    # packed [W | b]: (H_out, H_in + 1)
            k = w_ref.shape[1] - 1
            h = (jnp.dot(w_ref[:, :k], h, preferred_element_type=jnp.float32)
                 + w_ref[:, k:k + 1])             # (H_out, 1) bias, broadcast along lanes
        pred = h                                   # (dim, TB)

        # --- ScoreFromVectorField epilogue (alpha(t)=t, beta(t)=1-t  =>  den == 1-t) ---
        x_t = xt1_t[0:dim, :]                      # (dim, TB)
        t_t = xt1_t[dim:dim + 1, :]                # (1, TB)
        one_minus_t = 1.0 - t_t
        # Exact reciprocal: the epilogue is only a handful of vregs in this layout, and
        # exactness keeps the t -> 1 singular region inside the 1e-5 tolerance.
        inv_den = pl.reciprocal(one_minus_t, approx=False)
        score = (t_t * pred - x_t) * inv_den       # (dim, TB)

        out_ref[...] = jnp.transpose(score).astype(out_ref.dtype)   # (TB, dim)

    return kernel


def score_from_vector_field(x, t, packed_weights, *, tile_bs=1024):
    """x: (bs, dim) f32, t: (bs, 1) f32, packed_weights: list of (out, in+1) [W|b] arrays.
    Returns score: (bs, dim) f32.  No wrapper-side pad/transpose HLOs."""
    bs, dim = x.shape
    n_layers = len(packed_weights)

    # Tile the batch axis.  Prefer >= 2 (even) tiles when the batch is large enough so both
    # v7x TensorCores get work under the "parallel" grid axis (no-op on v5e/v6e).
    if pl.cdiv(bs, tile_bs) < 2 and bs >= 512:
        tile_bs = ((bs + 1) // 2 + 127) // 128 * 128
    tile_bs = max(8, min(tile_bs, ((bs + 7) // 8) * 8))
    n_tiles = pl.cdiv(bs, tile_bs)

    kernel = _make_kernel(n_layers, dim, bs, tile_bs)

    # Weights: full-array blocks pinned at (0, 0) -> DMA'd once, VMEM-resident across steps.
    w_specs = [pl.BlockSpec(w.shape, lambda i: (0, 0)) for w in packed_weights]

    return pl.pallas_call(
        kernel,
        out_shape=jax.ShapeDtypeStruct((bs, dim), jnp.float32),
        grid_spec=pltpu.PrefetchScalarGridSpec(
            num_scalar_prefetch=0,
            grid=(n_tiles,),
            in_specs=[pl.BlockSpec((tile_bs, dim), lambda i: (i, 0)),   # x
                      pl.BlockSpec((tile_bs, 1), lambda i: (i, 0)),     # t
                      *w_specs],
            out_specs=pl.BlockSpec((tile_bs, dim), lambda i: (i, 0)),
        ),
        compiler_params=pltpu.CompilerParams(
            dimension_semantics=("parallel",)),     # megacore sharding on v7x
    )(x, t, *packed_weights)


def init_params(key, dim, hiddens):
    """Deterministic init of build_mlp([dim+1] + hiddens + [dim]) (torch.nn.Linear-style
    U(-1/sqrt(fan_in), 1/sqrt(fan_in))).  Each layer is packed as [W | b]: (out, in+1);
    layer 0's columns are ordered [x-cols..., t-col, bias-col] to match concat([x, t, 1])."""
    dims = [dim + 1] + list(hiddens) + [dim]
    keys = jax.random.split(key, 2 * (len(dims) - 1))
    packed = []
    for i in range(len(dims) - 1):
        fan_in, fan_out = dims[i], dims[i + 1]
        bound = 1.0 / (fan_in ** 0.5)
        w = jax.random.uniform(keys[2 * i], (fan_out, fan_in),
                               minval=-bound, maxval=bound, dtype=jnp.float32)
        b = jax.random.uniform(keys[2 * i + 1], (fan_out, 1),
                               minval=-bound, maxval=bound, dtype=jnp.float32)
        packed.append(jnp.concatenate([w, b], axis=1))
    return packed


def reference(x, t, packed_weights):
    """Pure-JAX reference (full, un-simplified score formula) for sanity checking."""
    def silu(h):
        return h / (1.0 + jnp.exp(-h))

    h = jnp.concatenate([x, t], axis=-1)
    n = len(packed_weights)
    for i, wp in enumerate(packed_weights):
        w, b = wp[:, :-1], wp[:, -1]
        h = h @ w.T + b
        if i < n - 1:
            h = silu(h)
    pred = h
    alpha_t, d_alpha_t = t, jnp.ones_like(t)
    beta_t, d_beta_t = 1.0 - t, -jnp.ones_like(t)
    num = alpha_t * pred - d_alpha_t * x
    den = beta_t ** 2 * d_alpha_t - alpha_t * d_beta_t * beta_t
    return num / den


if __name__ == "__main__":
    # Exercises: 2 even grid tiles (both v7x cores) + a ragged last tile (in-kernel mask).
    bs, dim, hiddens = 1000, 4, [32, 32]

    key = jax.random.PRNGKey(0)
    kx, kt, kp = jax.random.split(key, 3)
    x = jax.random.normal(kx, (bs, dim), dtype=jnp.float32)
    # keep t away from 1: denominator -> 0 as t -> 1 (would give inf/NaN by construction)
    t = jax.random.uniform(kt, (bs, 1), minval=0.05, maxval=0.9, dtype=jnp.float32)
    params = init_params(kp, dim, hiddens)

    out = score_from_vector_field(x, t, params)
    out = jax.block_until_ready(out)

    ref = reference(x, t, params)
    assert out.shape == (bs, dim)
    assert jnp.allclose(out, ref, rtol=1e-5, atol=1e-5), "mismatch vs reference"
    print("KERNEL_OK")
</pallas_src>

<mosaic_0001>
module attributes {stable_mosaic.version = 11 : i64} {
  func.func @kernel(%arg0: i32, %arg1: memref<512x4xf32, #tpu.memory_space<vmem>>, %arg2: memref<512x1xf32, #tpu.memory_space<vmem>>, %arg3: memref<32x6xf32, #tpu.memory_space<vmem>>, %arg4: memref<32x33xf32, #tpu.memory_space<vmem>>, %arg5: memref<4x33xf32, #tpu.memory_space<vmem>>, %arg6: memref<512x4xf32, #tpu.memory_space<vmem>>) attributes {dimension_semantics = [#tpu.dimension_semantics<parallel>], iteration_bounds = array<i64: 2>, scalar_prefetch = 0 : i64, scratch_operands = 0 : i64, tpu.core_type = #tpu.core_type<tc>, window_params = [{transform_indices = @transform_0, window_bounds = array<i64: 512, 4>}, {transform_indices = @transform_1, window_bounds = array<i64: 512, 1>}, {pipeline_mode = #tpu.pipeline_mode<synchronous>, transform_indices = @transform_2, window_bounds = array<i64: 32, 6>}, {pipeline_mode = #tpu.pipeline_mode<synchronous>, transform_indices = @transform_3, window_bounds = array<i64: 32, 33>}, {pipeline_mode = #tpu.pipeline_mode<synchronous>, transform_indices = @transform_4, window_bounds = array<i64: 4, 33>}, {transform_indices = @transform_5, window_bounds = array<i64: 512, 4>}]} {
    %c0 = arith.constant 0 : index
    %c0_0 = arith.constant 0 : index
    %0 = vector.load %arg1[%c0, %c0_0] : memref<512x4xf32, #tpu.memory_space<vmem>>, vector<512x4xf32>
    %c0_1 = arith.constant 0 : index
    %c0_2 = arith.constant 0 : index
    %1 = vector.load %arg2[%c0_1, %c0_2] : memref<512x1xf32, #tpu.memory_space<vmem>>, vector<512x1xf32>
    %c512_i32 = arith.constant 512 : i32
    %2 = arith.muli %arg0, %c512_i32 : i32
    %3 = tpu.iota {dimensions = array<i32: 0>} : vector<512x1xi32>
    %4 = vector.broadcast %2 : i32 to vector<512x1xi32>
    %5 = arith.addi %4, %3 : vector<512x1xi32>
    %c1000_i32 = arith.constant 1000 : i32
    %6 = vector.broadcast %c1000_i32 : i32 to vector<512x1xi32>
    %7 = arith.cmpi slt, %5, %6 : vector<512x1xi32>
    %cst = arith.constant 0.000000e+00 : f32
    %8 = vector.broadcast %cst : f32 to vector<512x1xf32>
    %9 = arith.select %7, %1, %8 : vector<512x1xi1>, vector<512x1xf32>
    %cst_3 = arith.constant 0.000000e+00 : f32
    %10 = vector.shape_cast %7 : vector<512x1xi1> to vector<512x1xi1>
    %11 = vector.broadcast %10 : vector<512x1xi1> to vector<512x4xi1>
    %12 = vector.broadcast %cst_3 : f32 to vector<512x4xf32>
    %13 = arith.select %11, %0, %12 : vector<512x4xi1>, vector<512x4xf32>
    %cst_4 = arith.constant 1.000000e+00 : f32
    %14 = vector.broadcast %cst_4 : f32 to vector<512x1xf32>
    %15 = tpu.concatenate %13, %9, %14 in 1 : vector<512x4xf32>, vector<512x1xf32>, vector<512x1xf32> -> vector<512x6xf32>
    %16 = tpu.transpose %15, [1, 0] : vector<512x6xf32> -> vector<6x512xf32>
    %c0_5 = arith.constant 0 : index
    %c0_6 = arith.constant 0 : index
    %17 = vector.load %arg3[%c0_5, %c0_6] : memref<32x6xf32, #tpu.memory_space<vmem>>, vector<32x6xf32>
    %cst_7 = arith.constant dense<0.000000e+00> : vector<32x512xf32>
    %18 = tpu.matmul %17, %16, %cst_7 {dimension_numbers = #tpu.dot_dimension_numbers<[1], [0], [0], [1], [0, 0, 1, 1], [], []>} : vector<32x6xf32>, vector<6x512xf32>, vector<32x512xf32> -> vector<32x512xf32>
    %cst_8 = arith.constant 5.000000e-01 : f32
    %19 = vector.broadcast %cst_8 : f32 to vector<32x512xf32>
    %20 = arith.mulf %19, %18 : vector<32x512xf32>
    %21 = math.tanh %20 : vector<32x512xf32>
    %cst_9 = arith.constant 5.000000e-01 : f32
    %22 = vector.broadcast %cst_9 : f32 to vector<32x512xf32>
    %23 = arith.mulf %22, %21 : vector<32x512xf32>
    %cst_10 = arith.constant 5.000000e-01 : f32
    %24 = vector.broadcast %cst_10 : f32 to vector<32x512xf32>
    %25 = arith.addf %23, %24 : vector<32x512xf32>
    %26 = arith.mulf %18, %25 : vector<32x512xf32>
    %c0_11 = arith.constant 0 : index
    %c0_12 = arith.constant 0 : index
    %27 = vector.load %arg4[%c0_11, %c0_12] : memref<32x33xf32, #tpu.memory_space<vmem>>, vector<32x32xf32>
    %cst_13 = arith.constant dense<0.000000e+00> : vector<32x512xf32>
    %28 = tpu.matmul %27, %26, %cst_13 {dimension_numbers = #tpu.dot_dimension_numbers<[1], [0], [0], [1], [0, 0, 1, 1], [], []>} : vector<32x32xf32>, vector<32x512xf32>, vector<32x512xf32> -> vector<32x512xf32>
    %c0_14 = arith.constant 0 : index
    %c32 = arith.constant 32 : index
    %29 = vector.load %arg4[%c0_14, %c32] : memref<32x33xf32, #tpu.memory_space<vmem>>, vector<32x1xf32>
    %30 = vector.broadcast %29 : vector<32x1xf32> to vector<32x512xf32>
    %31 = arith.addf %28, %30 : vector<32x512xf32>
    %cst_15 = arith.constant 5.000000e-01 : f32
    %32 = vector.broadcast %cst_15 : f32 to vector<32x512xf32>
    %33 = arith.mulf %32, %31 : vector<32x512xf32>
    %34 = math.tanh %33 : vector<32x512xf32>
    %cst_16 = arith.constant 5.000000e-01 : f32
    %35 = vector.broadcast %cst_16 : f32 to vector<32x512xf32>
    %36 = arith.mulf %35, %34 : vector<32x512xf32>
    %cst_17 = arith.constant 5.000000e-01 : f32
    %37 = vector.broadcast %cst_17 : f32 to vector<32x512xf32>
    %38 = arith.addf %36, %37 : vector<32x512xf32>
    %39 = arith.mulf %31, %38 : vector<32x512xf32>
    %c0_18 = arith.constant 0 : index
    %c0_19 = arith.constant 0 : index
    %40 = vector.load %arg5[%c0_18, %c0_19] : memref<4x33xf32, #tpu.memory_space<vmem>>, vector<4x32xf32>
    %cst_20 = arith.constant dense<0.000000e+00> : vector<4x512xf32>
    %41 = tpu.matmul %40, %39, %cst_20 {dimension_numbers = #tpu.dot_dimension_numbers<[1], [0], [0], [1], [0, 0, 1, 1], [], []>} : vector<4x32xf32>, vector<32x512xf32>, vector<4x512xf32> -> vector<4x512xf32>
    %c0_21 = arith.constant 0 : index
    %c32_22 = arith.constant 32 : index
    %42 = vector.load %arg5[%c0_21, %c32_22] : memref<4x33xf32, #tpu.memory_space<vmem>>, vector<4x1xf32>
    %43 = vector.broadcast %42 : vector<4x1xf32> to vector<4x512xf32>
    %44 = arith.addf %41, %43 : vector<4x512xf32>
    %45 = vector.extract_strided_slice %16 {offsets = [0, 0], sizes = [4, 512], strides = [1, 1]} : vector<6x512xf32> to vector<4x512xf32>
    %46 = vector.extract_strided_slice %16 {offsets = [4, 0], sizes = [1, 512], strides = [1, 1]} : vector<6x512xf32> to vector<1x512xf32>
    %cst_23 = arith.constant 1.000000e+00 : f32
    %47 = vector.broadcast %cst_23 : f32 to vector<1x512xf32>
    %48 = arith.subf %47, %46 : vector<1x512xf32>
    %49 = tpu.reciprocal %48 : vector<1x512xf32> -> vector<1x512xf32>
    %50 = vector.broadcast %46 : vector<1x512xf32> to vector<4x512xf32>
    %51 = arith.mulf %50, %44 : vector<4x512xf32>
    %52 = arith.subf %51, %45 : vector<4x512xf32>
    %53 = vector.broadcast %49 : vector<1x512xf32> to vector<4x512xf32>
    %54 = arith.mulf %52, %53 : vector<4x512xf32>
    %55 = tpu.transpose %54, [1, 0] : vector<4x512xf32> -> vector<512x4xf32>
    %c0_24 = arith.constant 0 : index
    %c0_25 = arith.constant 0 : index
    %56 = vector.load %arg6[%c0_24, %c0_25] : memref<512x4xf32, #tpu.memory_space<vmem>>, vector<512x4xf32>
    tpu.vector_store %arg6[%c0_24, %c0_25], %55 {strides = array<i32>} : memref<512x4xf32, #tpu.memory_space<vmem>>, vector<512x4xf32>,
    return
  }
  func.func @transform_0(%arg0: i32) -> (i32, i32) {
    %c0_i32 = arith.constant 0 : i32
    %c0_i32_0 = arith.constant 0 : i32
    return %arg0, %c0_i32 : i32, i32
  }
  func.func @transform_1(%arg0: i32) -> (i32, i32) {
    %c0_i32 = arith.constant 0 : i32
    %c0_i32_0 = arith.constant 0 : i32
    return %arg0, %c0_i32 : i32, i32
  }
  func.func @transform_2(%arg0: i32) -> (i32, i32) {
    %c0_i32 = arith.constant 0 : i32
    %c0_i32_0 = arith.constant 0 : i32
    %c0_i32_1 = arith.constant 0 : i32
    return %c0_i32, %c0_i32_0 : i32, i32
  }
  func.func @transform_3(%arg0: i32) -> (i32, i32) {
    %c0_i32 = arith.constant 0 : i32
    %c0_i32_0 = arith.constant 0 : i32
    %c0_i32_1 = arith.constant 0 : i32
    return %c0_i32, %c0_i32_0 : i32, i32
  }
  func.func @transform_4(%arg0: i32) -> (i32, i32) {
    %c0_i32 = arith.constant 0 : i32
    %c0_i32_0 = arith.constant 0 : i32
    %c0_i32_1 = arith.constant 0 : i32
    return %c0_i32, %c0_i32_0 : i32, i32
  }
  func.func @transform_5(%arg0: i32) -> (i32, i32) {
    %c0_i32 = arith.constant 0 : i32
    %c0_i32_0 = arith.constant 0 : i32
    return %arg0, %c0_i32 : i32, i32
  }
}

</mosaic_0001>

<bundles_post_ra>
// kernel: tpu_custom_call.1
= control target key start
LH: loop header
LB: loop body
LE: loop exit
PB: predicated region body
PF: predicated region fallthrough
CT: control target
= control target key end

     0   :  { %s3172_s18 = smov 0   ;;  %s3174_s19 = smov 0   ;;  %s4903_s0 = inlined_call_operand.vmem [shape: f32[1000,4], index: 0, kind: input, shape index: {}]   ;;  %s4904_s1 = inlined_call_operand.vmem [shape: f32[1000,1], index: 1, kind: input, shape index: {}]   ;;  %s4905_s2 = inlined_call_operand.vmem [shape: f32[32,6], index: 2, kind: input, shape index: {}]   ;;  %s4906_s3 = inlined_call_operand.vmem [shape: f32[32,33], index: 3, kind: input, shape index: {}]   ;;  %s4907_s4 = inlined_call_operand.vmem [shape: f32[4,33], index: 4, kind: input, shape index: {}]   ;;  %s4908_s5 = inlined_call_operand.vmem [shape: f32[1000,4], index: 5, kind: output, shape index: {}]  }
   0x1   :  { %s3176_s20 = smov 0  }
   0x2 LB: > { %s3185_s21 = sadd.s32 4294967295, %s3105_s20   ;;  %s3187_s22 = sadd.s32 1, %s3105_s20   ;;  %s3105_s20 = sphi %s3176_s20, %s5014_s20   ;;  %s3101_s19 = sphi %s3174_s19, %s5013_s19   ;;  %s3097_s18 = sphi %s3172_s18, %s5012_s18  }
   0x3   : > { %s134_s23 = ssub.s32 %s3105_s20, %s3187_s22  ;;  %s137_s24 = sadd.s32 1, %s3101_s19 }
   0x4   : > { %p135_p0 = scmp.eq.s32.totalorder %s134_s23, 0  ;;  %p147_p1 = scmp.ne.s32.totalorder %s3101_s19, %s3097_s18 }
   0x5   : > { %p148_p2 = scmp.eq.s32.totalorder %s3185_s21, 1  ;;  %p2837_p3 = scmp.ge.s32.totalorder %s3105_s20, 1 }
   0x6   : > { %s3195_s25 = scalar_select %p135_p0, %s3101_s19, %s137_s24  }
   0x7   : > { %p3197_p4 = por %p148_p2, %p147_p1  ;;  %p215_p5 = scmp.lt.s32.totalorder %s3105_s20, 3 }
   0x9   : > { %p216_p6 = pnand %p2837_p3, %p215_p5 }
   0xb   : > { %219 = sbr.rel (%p216_p6) target bundleno = 1387 (0x56b), region = 40 }
  0x10   : > { %s3202_s27 = sshll.u32 %s3185_s21, 6  ;;  %s2843_s28 = sshll.u32 %s3185_s21, 9  ;;  %v417_v0 = vlaneseq }
  0x11   : > { %p260_p7 = scmp.lt.s32.totalorder %s3202_s27, 124  ;;  %v3208_v1 = vstv %s2843_s28  ;;  %s3139_s12 = smov 4  }
  0x12   : > { %v3210_v2 = vshrl.u32 %v417_v0, 7  ;;  %s252_s14 = sand.u32 1, %s3097_s18   ;;  %s2362_s18 = ssub.s32 (%p3197_p4), 125, %s3202_s27 }
  0x13   : > { %s261_s29 = scalar_select %p260_p7, %s3202_s27, 124 }
  0x14   : > { %4924 = vst [vmem:[#allocation3_spill] sm:$0xff] %v3210_v2  ;;  %v483_v3 = vadd.s32 %v3208_v1, %v3210_v2  ;;  %v434_v4 = vadd.s32 128, %v3210_v2  ;;  %v450_v5 = vadd.s32 256, %v3210_v2  ;;  %v466_v6 = vadd.s32 384, %v3210_v2  ;;  %s2838_s15 = sshll.u32 %s252_s14, 9  ;;  %s4704_s23 = scalar_lea.vmem (%p3197_p4), %s4908_s5, %s2843_s28  }
  0x15   : > { %s2840_s30 = sshll.u32 %s261_s29, 3  ;;  %v467_v7 = vadd.s32 392, %v3210_v2  ;;  %v435_v8 = vadd.s32 136, %v3210_v2  ;;  %v451_v9 = vadd.s32 264, %v3210_v2  ;;  %v419_v10 = vadd.s32 8, %v3210_v2  ;;  %s4566_s16 = scalar_lea.vmem [#allocation2], %s2838_s15  }
  0x16   : > { %s3225_s8 = scalar_lea.vmem %s4904_s1, %s2840_s30  ;;  %vm547_vm0 = vcmp.lt.s32.totalorder %v483_v3, 1000  ;;  %s3230_s11 = scalar_lea.vmem %s4903_s0, %s2840_s30  ;;  %v499_v11 = vadd.s32 %v3208_v1, %v434_v4  ;;  %v3234_v12 = vadd.s32 %v3208_v1, %v450_v5  ;;  %v3237_v13 = vadd.s32 %v3208_v1, %v466_v6 }
  0x17   : > { %v352_v14 = vld [vmem:[%s3225_s8] sm:$0xff]  ;;  %v532_v17 = vadd.s32 %v3208_v1, %v467_v7  ;;  %v500_v18 = vadd.s32 %v3208_v1, %v435_v8  ;;  %v516_v19 = vadd.s32 %v3208_v1, %v451_v9  ;;  %v3246_v20 = vadd.s32 %v3208_v1, %v419_v10  ;;  %v401_v29 = vld [vmem:[%s3225_s8 + $0x188] sm:$0xff]  ;;  %v338_v43 = vld [vmem:[%s3230_s11 + $0x190] sm:$0xff]  ;;  %p2363_p8 = scmp.lt.s32.totalorder (%p3197_p4), %s2362_s18, 64 }
  0x18   : > { %v288_v15 = vld [vmem:[%s3230_s11] sm:$0xff]  ;;  %v611_v21 = vsel %vm547_vm0, %v352_v14, 0.0  ;;  %vm563_vm1 = vcmp.lt.s32.totalorder %v499_v11, 1000  ;;  %vm4910_vm2 = vcmp.lt.s32.totalorder %v3234_v12, 1000  ;;  %vm4909_vm3 = vcmp.lt.s32.totalorder %v3237_v13, 1000  ;;  %v337_v30 = vld [vmem:[%s3230_s11 + $0x188] sm:$0xff] }
  0x19   : > { %v368_v16 = vld [vmem:[%s3225_s8 + $0x80] sm:$0xff]  ;;  %v3248_v22 = vsel %vm547_vm0, %v288_v15, 0.0  ;;  %931 = vrot.lane.b32.xlu1 %v611_v21, %s3139_s12  ;;  %vm596_vm4 = vcmp.lt.s32.totalorder %v532_v17, 1000  ;;  %vm564_vm5 = vcmp.lt.s32.totalorder %v500_v18, 1000  ;;  %v305_v31 = vld [vmem:[%s3230_s11 + $0x88] sm:$0xff]  ;;  %vm580_vm6 = vcmp.lt.s32.totalorder %v516_v19, 1000 }
  0x1a   : > { %v304_v23 = vld [vmem:[%s3230_s11 + $0x80] sm:$0xff]  ;;  %v627_v25 = vsel %vm563_vm1, %v368_v16, 0.0  ;;  %v3266_v33 = vsel %vm596_vm4, %v337_v30, 0.0  ;;  %v3269_v34 = vsel %vm564_vm5, %v305_v31, 0.0  ;;  %v321_v35 = vld [vmem:[%s3230_s11 + $0x108] sm:$0xff]  ;;  %vm548_vm7 = vcmp.lt.s32.totalorder %v3246_v20, 1000 }
  0x1b   : > { %v384_v24 = vld [vmem:[%s3225_s8 + $0x100] sm:$0xff]  ;;  %v3254_v26 = vsel %vm563_vm1, %v304_v23, 0.0  ;;  %963 = vrot.lane.b32.xlu0 %v627_v25, %s3139_s12  ;;  %v369_v36 = vld [vmem:[%s3225_s8 + $0x88] sm:$0xff]  ;;  %v468_v38 = vadd.s32 400, %v3210_v2  ;;  %v660_v39 = vsel %vm596_vm4, %v401_v29, 0.0  ;;  %v3278_v40 = vsel %vm580_vm6, %v321_v35, 0.0 }
  0x1c   : > { %v400_v27 = vld [vmem:[%s3225_s8 + $0x180] sm:$0xff]  ;;  %v643_v28 = vsel %vm4910_vm2, %v384_v24, 0.0  ;;  %v289_v37 = vld [vmem:[%s3230_s11 + $0x8] sm:$0xff]  ;;  %v436_v44 = vadd.s32 144, %v3210_v2  ;;  %v452_v45 = vadd.s32 272, %v3210_v2  ;;  %v420_v46 = vadd.s32 16, %v3210_v2 }
  0x1d   : > { %v659_v32 = vsel %vm4909_vm3, %v400_v27, 0.0  ;;  %995 = vrot.lane.b32.xlu1 %v643_v28, %s3139_s12  ;;  %v3282_v41 = vsel %vm548_vm7, %v289_v37, 0.0  ;;  %v533_v42 = vadd.s32 %v3208_v1, %v468_v38  ;;  %v628_v47 = vsel %vm564_vm5, %v369_v36, 0.0  ;;  %v385_v48 = vld [vmem:[%s3225_s8 + $0x108] sm:$0xff]  ;;  %v306_v54 = vld [vmem:[%s3230_s11 + $0x90] sm:$0xff]  ;;  %v339_v0 = vld [vmem:[%s3230_s11 + $0x198] sm:$0xff] }
  0x1e   : > { %4925 = vst [vmem:[#allocation4_spill] sm:$0xff] %v3282_v41  ;;  %v469_v49 = vadd.s32 408, %v3210_v2  ;;  %v437_v50 = vadd.s32 152, %v3210_v2  ;;  %v453_v51 = vadd.s32 280, %v3210_v2  ;;  %v353_v52 = vld [vmem:[%s3225_s8 + $0x8] sm:$0xff]  ;;  %v501_v53 = vadd.s32 %v3208_v1, %v436_v44  ;;  %v322_v56 = vld [vmem:[%s3230_s11 + $0x110] sm:$0xff] }
  0x1f   : > { %1027 = vrot.lane.b32.xlu0 %v659_v32, %s3139_s12  ;;  %vm597_vm8 = vcmp.lt.s32.totalorder %v533_v42, 1000  ;;  %v517_v55 = vadd.s32 %v3208_v1, %v452_v45  ;;  %v485_v57 = vadd.s32 %v3208_v1, %v420_v46  ;;  %v290_v59 = vld [vmem:[%s3230_s11 + $0x10] sm:$0xff]  ;;  %v644_v62 = vsel %vm580_vm6, %v385_v48, 0.0  ;;  %v307_v3 = vld [vmem:[%s3230_s11 + $0x98] sm:$0xff]  ;;  %v340_v30 = vld [vmem:[%s3230_s11 + $0x1a0] sm:$0xff] }
  0x20   : > { %v3303_v58 = vsel %vm597_vm8, %v338_v43, 0.0  ;;  %v3307_v60 = vadd.s32 %v3208_v1, %v469_v49  ;;  %v3310_v61 = vadd.s32 %v3208_v1, %v437_v50  ;;  %v402_v63 = vld [vmem:[%s3225_s8 + $0x190] sm:$0xff]  ;;  %vm565_vm9 = vcmp.lt.s32.totalorder %v501_v53, 1000  ;;  %v323_v10 = vld [vmem:[%s3230_s11 + $0x118] sm:$0xff]  ;;  %v308_v36 = vld [vmem:[%s3230_s11 + $0xa0] sm:$0xff] }
  0x21   : > { %1029 = vrot.lane.b32.xlu1 %v660_v39, %s3139_s12  ;;  %vm581_vm10 = vcmp.lt.s32.totalorder %v517_v55, 1000  ;;  %v3318_v4 = vadd.s32 %v3208_v1, %v453_v51  ;;  %v612_v5 = vsel %vm548_vm7, %v353_v52, 0.0  ;;  %v3323_v6 = vsel %vm565_vm9, %v306_v54, 0.0  ;;  %v370_v8 = vld [vmem:[%s3225_s8 + $0x90] sm:$0xff]  ;;  %v291_v28 = vld [vmem:[%s3230_s11 + $0x18] sm:$0xff]  ;;  %v324_v43 = vld [vmem:[%s3230_s11 + $0x120] sm:$0xff] }
  0x22   : > { %v3326_v7 = vsel %vm581_vm10, %v322_v56, 0.0  ;;  %vm549_vm11 = vcmp.lt.s32.totalorder %v485_v57, 1000  ;;  %vm598_vm12 = vcmp.lt.s32.totalorder %v3307_v60, 1000  ;;  %vm566_vm13 = vcmp.lt.s32.totalorder %v3310_v61, 1000  ;;  %v386_v16 = vld [vmem:[%s3225_s8 + $0x110] sm:$0xff]  ;;  %v403_v42 = vld [vmem:[%s3225_s8 + $0x198] sm:$0xff] }
  0x23   : > { %965 = vrot.lane.b32.xlu0 %v628_v47, %s3139_s12  ;;  %v3330_v9 = vsel %vm549_vm11, %v290_v59, 0.0  ;;  %v661_v11 = vsel %vm597_vm8, %v402_v63, 0.0  ;;  %v3339_v14 = vsel %vm598_vm12, %v339_v0, 0.0  ;;  %v3343_v15 = vsel %vm566_vm13, %v307_v3, 0.0  ;;  %v354_v25 = vld [vmem:[%s3225_s8 + $0x10] sm:$0xff]  ;;  %v292_v44 = vld [vmem:[%s3230_s11 + $0x20] sm:$0xff] }
  0x24   : > { %vm582_vm14 = vcmp.lt.s32.totalorder %v3318_v4, 1000  ;;  %v421_v17 = vadd.s32 24, %v3210_v2  ;;  %v470_v18 = vadd.s32 416, %v3210_v2  ;;  %v438_v19 = vadd.s32 160, %v3210_v2  ;;  %v371_v50 = vld [vmem:[%s3225_s8 + $0x98] sm:$0xff]  ;;  %v341_v52 = vld [vmem:[%s3230_s11 + $0x1a8] sm:$0xff] }
  0x25   : > { %997 = vrot.lane.b32.xlu1 %v644_v62, %s3139_s12  ;;  %v629_v20 = vsel %vm565_vm9, %v370_v8, 0.0  ;;  %v3354_v21 = vsel %vm582_vm14, %v323_v10, 0.0  ;;  %v454_v23 = vadd.s32 288, %v3210_v2  ;;  %v422_v24 = vadd.s32 32, %v3210_v2  ;;  %v387_v56 = vld [vmem:[%s3225_s8 + $0x118] sm:$0xff]  ;;  %v309_v59 = vld [vmem:[%s3230_s11 + $0xa8] sm:$0xff] }
  0x26   : > { %v3360_v27 = vadd.s32 %v3208_v1, %v421_v17  ;;  %v3364_v29 = vadd.s32 %v3208_v1, %v470_v18  ;;  %v3368_v31 = vadd.s32 %v3208_v1, %v438_v19  ;;  %v471_v32 = vadd.s32 424, %v3210_v2  ;;  %v325_v62 = vld [vmem:[%s3230_s11 + $0x128] sm:$0xff]  ;;  %v355_v10 = vld [vmem:[%s3225_s8 + $0x18] sm:$0xff] }
  0x27   : > { %933 = vrot.lane.b32.xlu0 %v612_v5, %s3139_s12  ;;  %v645_v35 = vsel %vm581_vm10, %v386_v16, 0.0  ;;  %v3375_v37 = vadd.s32 %v3208_v1, %v454_v23  ;;  %v3378_v38 = vadd.s32 %v3208_v1, %v422_v24  ;;  %v439_v39 = vadd.s32 168, %v3210_v2  ;;  %v293_v61 = vld [vmem:[%s3230_s11 + $0x28] sm:$0xff]  ;;  %v342_v24 = vld [vmem:[%s3230_s11 + $0x1b0] sm:$0xff] }
  0x28   : > { %vm550_vm15 = vcmp.lt.s32.totalorder %v3360_v27, 1000  ;;  %vm599_vm0 = vcmp.lt.s32.totalorder %v3364_v29, 1000  ;;  %v3388_v45 = vadd.s32 %v3208_v1, %v471_v32  ;;  %v455_v46 = vadd.s32 296, %v3210_v2  ;;  %v372_v32 = vld [vmem:[%s3225_s8 + $0xa0] sm:$0xff] }
  0x29   : > { %1031 = vrot.lane.b32.xlu1 %v661_v11, %s3139_s12  ;;  %v613_v47 = vsel %vm549_vm11, %v354_v25, 0.0  ;;  %v3394_v48 = vsel %vm550_vm15, %v291_v28, 0.0  ;;  %v3398_v49 = vsel %vm599_vm0, %v340_v30, 0.0  ;;  %vm567_vm1 = vcmp.lt.s32.totalorder %v3368_v31, 1000  ;;  %v310_v25 = vld [vmem:[%s3230_s11 + $0xb0] sm:$0xff] }
  0x2a   : > { %4926 = vst [vmem:[#allocation5_spill] sm:$0xff] %v3398_v49  ;;  %v3404_v51 = vsel %vm567_vm1, %v308_v36, 0.0  ;;  %vm583_vm4 = vcmp.lt.s32.totalorder %v3375_v37, 1000  ;;  %vm551_vm5 = vcmp.lt.s32.totalorder %v3378_v38, 1000  ;;  %v662_v53 = vsel %vm598_vm12, %v403_v42, 0.0  ;;  %v326_v36 = vld [vmem:[%s3230_s11 + $0x130] sm:$0xff] }
  0x2b   : > { %967 = vrot.lane.b32.xlu0 %v629_v20, %s3139_s12  ;;  %v3414_v54 = vsel %vm583_vm4, %v324_v43, 0.0  ;;  %v3418_v55 = vsel %vm551_vm5, %v292_v44, 0.0  ;;  %vm600_vm6 = vcmp.lt.s32.totalorder %v3388_v45, 1000  ;;  %v3424_v57 = vadd.s32 %v3208_v1, %v439_v39  ;;  %v404_v20 = vld [vmem:[%s3225_s8 + $0x1a0] sm:$0xff]  ;;  %v327_v37 = vld [vmem:[%s3230_s11 + $0x138] sm:$0xff] }
  0x2c   : > { %v3428_v60 = vadd.s32 %v3208_v1, %v455_v46  ;;  %v423_v63 = vadd.s32 40, %v3210_v2  ;;  %v630_v0 = vsel %vm566_vm13, %v371_v50, 0.0  ;;  %v3436_v3 = vsel %vm600_vm6, %v341_v52, 0.0  ;;  %v388_v50 = vld [vmem:[%s3225_s8 + $0x120] sm:$0xff] }
  0x2d   : > { %999 = vrot.lane.b32.xlu1 %v645_v35, %s3139_s12  ;;  %4927 = vst [vmem:[#allocation6_spill] sm:$0xff] %v3436_v3  ;;  %v472_v5 = vadd.s32 432, %v3210_v2  ;;  %v440_v8 = vadd.s32 176, %v3210_v2  ;;  %vm568_vm7 = vcmp.lt.s32.totalorder %v3424_v57, 1000  ;;  %v456_v16 = vadd.s32 304, %v3210_v2  ;;  %v312_v38 = vld [vmem:[%s3230_s11 + $0xc0] sm:$0xff] }
  0x2e   : > { %vm584_vm8 = vcmp.lt.s32.totalorder %v3428_v60, 1000  ;;  %v3444_v11 = vadd.s32 %v3208_v1, %v423_v63  ;;  %v646_v17 = vsel %vm582_vm14, %v387_v56, 0.0  ;;  %v3453_v18 = vsel %vm568_vm7, %v309_v59, 0.0  ;;  %v343_v59 = vld [vmem:[%s3230_s11 + $0x1b8] sm:$0xff]  ;;  %v376_v3 = vld [vmem:[%s3225_s8 + $0xc0] sm:$0xff] }
  0x2f   : > { %935 = vrot.lane.b32.xlu0 %v613_v47, %s3139_s12  ;;  %v3457_v19 = vsel %vm584_vm8, %v325_v62, 0.0  ;;  %v3463_v23 = vadd.s32 %v3208_v1, %v472_v5  ;;  %v3467_v4 = vadd.s32 %v3208_v1, %v440_v8  ;;  %v3471_v28 = vadd.s32 %v3208_v1, %v456_v16  ;;  %v356_v5 = vld [vmem:[%s3225_s8 + $0x20] sm:$0xff]  ;;  %v311_v8 = vld [vmem:[%s3230_s11 + $0xb8] sm:$0xff] }
  0x30   : > { %vm552_vm9 = vcmp.lt.s32.totalorder %v3444_v11, 1000  ;;  %v614_v30 = vsel %vm550_vm15, %v355_v10, 0.0  ;;  %v424_v39 = vadd.s32 48, %v3210_v2  ;;  %v473_v42 = vadd.s32 440, %v3210_v2  ;;  %v297_v11 = vld [vmem:[%s3230_s11 + $0x48] sm:$0xff]  ;;  %v360_v49 = vld [vmem:[%s3225_s8 + $0x40] sm:$0xff] }
  0x31   : > { %1033 = vrot.lane.b32.xlu1 %v662_v53, %s3139_s12  ;;  %v3478_v35 = vsel %vm552_vm9, %v293_v61, 0.0  ;;  %vm601_vm10 = vcmp.lt.s32.totalorder %v3463_v23, 1000  ;;  %vm569_vm11 = vcmp.lt.s32.totalorder %v3467_v4, 1000  ;;  %v441_v27 = vadd.s32 184, %v3210_v2  ;;  %v294_v53 = vld [vmem:[%s3230_s11 + $0x30] sm:$0xff] }
  0x32   : > { %v663_v43 = vsel %vm599_vm0, %v404_v20, 0.0  ;;  %v3491_v44 = vsel %vm601_vm10, %v342_v24, 0.0  ;;  %v3495_v46 = vsel %vm569_vm11, %v310_v25, 0.0  ;;  %vm585_vm12 = vcmp.lt.s32.totalorder %v3471_v28, 1000  ;;  %v298_v28 = vld [vmem:[%s3230_s11 + $0x50] sm:$0xff] }
  0x33   : > { %969 = vrot.lane.b32.xlu0 %v630_v0, %s3139_s12  ;;  %4928 = vst [vmem:[#allocation7_spill] sm:$0xff] %v3491_v44  ;;  %4929 = vst [vmem:[#allocation8_spill] sm:$0xff] %v3495_v46  ;;  %v631_v47 = vsel %vm567_vm1, %v372_v32, 0.0  ;;  %v3504_v29 = vsel %vm585_vm12, %v326_v36, 0.0  ;;  %v3507_v52 = vadd.s32 %v3208_v1, %v424_v39  ;;  %v3511_v56 = vadd.s32 %v3208_v1, %v473_v42  ;;  %v405_v39 = vld [vmem:[%s3225_s8 + $0x1a8] sm:$0xff] }
  0x34   : > { %v3515_v62 = vadd.s32 %v3208_v1, %v441_v27  ;;  %v457_v63 = vadd.s32 312, %v3210_v2  ;;  %v425_v31 = vadd.s32 56, %v3210_v2  ;;  %v474_v0 = vadd.s32 448, %v3210_v2  ;;  %v344_v27 = vld [vmem:[%s3230_s11 + $0x1c0] sm:$0xff] }
  0x35   : > { %1001 = vrot.lane.b32.xlu1 %v646_v17, %s3139_s12  ;;  %vm553_vm13 = vcmp.lt.s32.totalorder %v3507_v52, 1000  ;;  %vm602_vm14 = vcmp.lt.s32.totalorder %v3511_v56, 1000  ;;  %v442_v10 = vadd.s32 192, %v3210_v2  ;;  %v458_v61 = vadd.s32 320, %v3210_v2  ;;  %v315_v52 = vld [vmem:[%s3230_s11 + $0xd8] sm:$0xff] }
  0x36   : > { %v647_v16 = vsel %vm583_vm4, %v388_v50, 0.0  ;;  %v3531_v17 = vsel %vm553_vm13, %v294_v53, 0.0  ;;  %v3535_v20 = vsel %vm602_vm14, %v343_v59, 0.0  ;;  %vm570_vm15 = vcmp.lt.s32.totalorder %v3515_v62, 1000  ;;  %v373_v50 = vld [vmem:[%s3225_s8 + $0xa8] sm:$0xff]  ;;  %v328_v53 = vld [vmem:[%s3230_s11 + $0x140] sm:$0xff] }
  0x37   : > { %937 = vrot.lane.b32.xlu0 %v614_v30, %s3139_s12  ;;  %4930 = vst [vmem:[#allocation9_spill] sm:$0xff] %v3535_v20  ;;  %v3540_v24 = vadd.s32 %v3208_v1, %v457_v63  ;;  %v3544_v25 = vadd.s32 %v3208_v1, %v425_v31  ;;  %v295_v30 = vld [vmem:[%s3230_s11 + $0x38] sm:$0xff]  ;;  %v3548_v32 = vadd.s32 %v3208_v1, %v474_v0  ;;  %v615_v36 = vsel %vm551_vm5, %v356_v5, 0.0  ;;  %v389_v5 = vld [vmem:[%s3225_s8 + $0x128] sm:$0xff]  ;;  %v406_v20 = vld [vmem:[%s3225_s8 + $0x1b0] sm:$0xff] }
  0x38   : > { %v3555_v42 = vsel %vm570_vm15, %v311_v8, 0.0  ;;  %v426_v59 = vadd.s32 64, %v3210_v2  ;;  %v664_v0 = vsel %vm600_vm6, %v405_v39, 0.0  ;;  %v443_v57 = vadd.s32 200, %v3210_v2 }
  0x39   : > { %1035 = vrot.lane.b32.xlu1 %v663_v43, %s3139_s12  ;;  %4931 = vst [vmem:[#allocation10_spill] sm:$0xff] %v3555_v42  ;;  %v3559_v43 = vadd.s32 %v3208_v1, %v442_v10  ;;  %vm586_vm0 = vcmp.lt.s32.totalorder %v3540_v24, 1000  ;;  %vm554_vm1 = vcmp.lt.s32.totalorder %v3544_v25, 1000  ;;  %vm603_vm4 = vcmp.lt.s32.totalorder %v3548_v32, 1000  ;;  %v391_v42 = vld [vmem:[%s3225_s8 + $0x138] sm:$0xff] }
  0x3a   : > { %v3573_v63 = vsel %vm586_vm0, %v327_v37, 0.0  ;;  %v3577_v31 = vsel %vm554_vm1, %v295_v30, 0.0  ;;  %v3586_v8 = vsel %vm603_vm4, %v344_v27, 0.0  ;;  %v632_v10 = vsel %vm568_vm7, %v373_v50, 0.0  ;;  %v296_v30 = vld [vmem:[%s3230_s11 + $0x40] sm:$0xff] }
  0x3b   : > { %971 = vrot.lane.b32.xlu0 %v631_v47, %s3139_s12  ;;  %v3562_v47 = vadd.s32 %v3208_v1, %v458_v61  ;;  %4932 = vst [vmem:[#allocation11_spill] sm:$0xff] %v3573_v63  ;;  %4933 = vst [vmem:[#allocation12_spill] sm:$0xff] %v3577_v31  ;;  %vm571_vm5 = vcmp.lt.s32.totalorder %v3559_v43, 1000  ;;  %v3602_v37 = vadd.s32 %v3208_v1, %v426_v59  ;;  %v459_v39 = vadd.s32 328, %v3210_v2  ;;  %v317_v31 = vld [vmem:[%s3230_s11 + $0xe8] sm:$0xff]  ;;  %v392_v63 = vld [vmem:[%s3225_s8 + $0x140] sm:$0xff] }
  0x3c   : > { %4934 = vst [vmem:[#allocation13_spill] sm:$0xff] %v3586_v8  ;;  %v3594_v61 = vsel %vm571_vm5, %v312_v38, 0.0  ;;  %v648_v27 = vsel %vm584_vm8, %v389_v5, 0.0  ;;  %v427_v50 = vadd.s32 72, %v3210_v2  ;;  %v476_v38 = vadd.s32 464, %v3210_v2  ;;  %v313_v5 = vld [vmem:[%s3230_s11 + $0xc8] sm:$0xff] }
  0x3d   : > { %1003 = vrot.lane.b32.xlu1 %v647_v16, %s3139_s12  ;;  %vm587_vm3 = vcmp.lt.s32.totalorder %v3562_v47, 1000  ;;  %4935 = vst [vmem:[#allocation14_spill] sm:$0xff] %v3594_v61  ;;  %v357_v16 = vld [vmem:[%s3225_s8 + $0x28] sm:$0xff]  ;;  %vm555_vm6 = vcmp.lt.s32.totalorder %v3602_v37, 1000  ;;  %v3621_v60 = vadd.s32 %v3208_v1, %v443_v57  ;;  %v3625_v41 = vadd.s32 %v3208_v1, %v459_v39  ;;  %v374_v61 = vld [vmem:[%s3225_s8 + $0xb0] sm:$0xff] }
  0x3e   : > { %v3598_v45 = vsel %vm587_vm3, %v328_v53, 0.0  ;;  %v444_v53 = vadd.s32 208, %v3210_v2  ;;  %v616_v8 = vsel %vm552_vm9, %v357_v16, 0.0  ;;  %v3639_v57 = vadd.s32 %v3208_v1, %v476_v38  ;;  %v346_v16 = vld [vmem:[%s3230_s11 + $0x1d0] sm:$0xff]  ;;  %v377_v37 = vld [vmem:[%s3225_s8 + $0xc8] sm:$0xff] }
  0x3f   : > { %939 = vrot.lane.b32.xlu0 %v615_v36, %s3139_s12  ;;  %4936 = vst [vmem:[#allocation15_spill] sm:$0xff] %v3598_v45  ;;  %v475_v36 = vadd.s32 456, %v3210_v2  ;;  %v329_v45 = vld [vmem:[%s3230_s11 + $0x148] sm:$0xff]  ;;  %vm572_vm8 = vcmp.lt.s32.totalorder %v3621_v60, 1000  ;;  %vm588_vm9 = vcmp.lt.s32.totalorder %v3625_v41, 1000  ;;  %v428_v4 = vadd.s32 80, %v3210_v2 }
  0x40   : > { %v3647_v39 = vadd.s32 %v3208_v1, %v444_v53  ;;  %v3657_v38 = vsel %vm572_vm8, %v313_v5, 0.0  ;;  %v665_v53 = vsel %vm601_vm10, %v406_v20, 0.0  ;;  %v633_v5 = vsel %vm569_vm11, %v374_v61, 0.0  ;;  %v358_v20 = vld [vmem:[%s3225_s8 + $0x30] sm:$0xff] }
  0x41   : > { %1037 = vrot.lane.b32.xlu1 %v664_v0, %s3139_s12  ;;  %v3617_v59 = vadd.s32 %v3208_v1, %v475_v36  ;;  %v345_v0 = vld [vmem:[%s3230_s11 + $0x1c8] sm:$0xff]  ;;  %v3636_v36 = vadd.s32 %v3208_v1, %v427_v50  ;;  %4939 = vst [vmem:[#allocation18_spill] sm:$0xff] %v3657_v38  ;;  %v477_v61 = vadd.s32 472, %v3210_v2  ;;  %v446_v62 = vadd.s32 224, %v3210_v2 }
  0x42   : > { %vm4912_vm10 = vcmp.lt.s32.totalorder %v3647_v39, 1000  ;;  %v447_v24 = vadd.s32 232, %v3210_v2  ;;  %v635_v46 = vsel %vm571_vm5, %v376_v3, 0.0  ;;  %v651_v3 = vsel %vm587_vm3, %v392_v63, 0.0 }
  0x43   : > { %973 = vrot.lane.b32.xlu0 %v632_v10, %s3139_s12  ;;  %v3632_v10 = vsel %vm555_vm6, %v296_v30, 0.0  ;;  %vm4911_vm7 = vcmp.lt.s32.totalorder %v3617_v59, 1000  ;;  %v460_v30 = vadd.s32 336, %v3210_v2  ;;  %vm556_vm2 = vcmp.lt.s32.totalorder %v3636_v36, 1000 }
  0x44   : > { %4937 = vst [vmem:[#allocation16_spill] sm:$0xff] %v3632_v10  ;;  %v3653_v50 = vsel %vm4911_vm7, %v345_v0, 0.0  ;;  %v390_v10 = vld [vmem:[%s3225_s8 + $0x130] sm:$0xff]  ;;  %vm605_vm7 = vcmp.lt.s32.totalorder %v3639_v57, 1000  ;;  %v448_v63 = vadd.s32 240, %v3210_v2  ;;  %v411_v57 = vld [vmem:[%s3225_s8 + $0x1d8] sm:$0xff] }
  0x45   : > { %1005 = vrot.lane.b32.xlu1 %v648_v27, %s3139_s12  ;;  %4938 = vst [vmem:[#allocation17_spill] sm:$0xff] %v3653_v50  ;;  %v3666_v27 = vsel %vm588_vm9, %v329_v45, 0.0  ;;  %v314_v0 = vld [vmem:[%s3230_s11 + $0xd0] sm:$0xff]  ;;  %v3675_v50 = vsel %vm556_vm2, %v297_v11, 0.0  ;;  %v3679_v23 = vsel %vm605_vm7, %v346_v16, 0.0  ;;  %v649_v11 = vsel %vm585_vm12, %v390_v10, 0.0 }
  0x46   : > { %4940 = vst [vmem:[#allocation19_spill] sm:$0xff] %v3666_v27  ;;  %4941 = vst [vmem:[#allocation20_spill] sm:$0xff] %v3675_v50  ;;  %v330_v45 = vld [vmem:[%s3230_s11 + $0x150] sm:$0xff]  ;;  %v3694_v16 = vsel %vm4912_vm10, %v314_v0, 0.0  ;;  %v445_v50 = vadd.s32 216, %v3210_v2  ;;  %v3705_v10 = vadd.s32 %v3208_v1, %v477_v61  ;;  %v429_v0 = vadd.s32 88, %v3210_v2 }
  0x47   : > { %941 = vrot.lane.b32.xlu0 %v616_v8, %s3139_s12  ;;  %4942 = vst [vmem:[#allocation21_spill] sm:$0xff] %v3679_v23  ;;  %v3684_v8 = vadd.s32 %v3208_v1, %v460_v30  ;;  %4943 = vst [vmem:[#allocation22_spill] sm:$0xff] %v3694_v16  ;;  %v461_v30 = vadd.s32 344, %v3210_v2  ;;  %v347_v23 = vld [vmem:[%s3230_s11 + $0x1d8] sm:$0xff]  ;;  %v617_v16 = vsel %vm553_vm13, %v358_v20, 0.0 }
  0x48   : > { %v407_v27 = vld [vmem:[%s3225_s8 + $0x1b8] sm:$0xff]  ;;  %vm4914_vm10 = vcmp.lt.s32.totalorder %v3705_v10, 1000  ;;  %v3728_v44 = vadd.s32 %v3208_v1, %v429_v0 }
  0x49   : > { %1039 = vrot.lane.b32.xlu1 %v665_v53, %s3139_s12  ;;  %vm4913_vm11 = vcmp.lt.s32.totalorder %v3684_v8, 1000  ;;  %v3701_v53 = vadd.s32 %v3208_v1, %v428_v4  ;;  %v3717_v4 = vadd.s32 %v3208_v1, %v445_v50  ;;  %v3720_v38 = vadd.s32 %v3208_v1, %v461_v30  ;;  %v375_v61 = vld [vmem:[%s3225_s8 + $0xb8] sm:$0xff] }
  0x4a   : > { %v331_v20 = vld [vmem:[%s3230_s11 + $0x158] sm:$0xff]  ;;  %v3738_v30 = vsel %vm4914_vm10, %v347_v23, 0.0  ;;  %v666_v0 = vsel %vm602_vm14, %v407_v27, 0.0  ;;  %v634_v23 = vsel %vm570_vm15, %v375_v61, 0.0  ;;  %vm558_vm14 = vcmp.lt.s32.totalorder %v3728_v44, 1000 }
  0x4b   : > { %975 = vrot.lane.b32.xlu0 %v633_v5, %s3139_s12  ;;  %v3714_v5 = vsel %vm4913_vm11, %v330_v45, 0.0  ;;  %vm557_vm12 = vcmp.lt.s32.totalorder %v3701_v53, 1000  ;;  %v478_v45 = vadd.s32 480, %v3210_v2  ;;  %4946 = vst [vmem:[#allocation25_spill] sm:$0xff] %v3738_v30  ;;  %vm574_vm13 = vcmp.lt.s32.totalorder %v3717_v4, 1000  ;;  %v359_v27 = vld [vmem:[%s3225_s8 + $0x38] sm:$0xff] }
  0x4c   : > { %4944 = vst [vmem:[#allocation23_spill] sm:$0xff] %v3714_v5  ;;  %v3734_v50 = vsel %vm557_vm12, %v298_v28, 0.0  ;;  %v299_v5 = vld [vmem:[%s3230_s11 + $0x58] sm:$0xff]  ;;  %vm590_vm11 = vcmp.lt.s32.totalorder %v3720_v38, 1000  ;;  %v348_v28 = vld [vmem:[%s3230_s11 + $0x1e0] sm:$0xff]  ;;  %v3755_v30 = vsel %vm574_vm13, %v315_v52, 0.0 }
  0x4d   : > { %1007 = vrot.lane.b32.xlu1 %v649_v11, %s3139_s12  ;;  %4945 = vst [vmem:[#allocation24_spill] sm:$0xff] %v3734_v50  ;;  %v3748_v11 = vadd.s32 %v3208_v1, %v478_v45  ;;  %4947 = vst [vmem:[#allocation26_spill] sm:$0xff] %v3755_v30  ;;  %v3759_v56 = vsel %vm590_vm11, %v331_v20, 0.0  ;;  %v650_v61 = vsel %vm586_vm0, %v391_v42, 0.0  ;;  %v462_v20 = vadd.s32 352, %v3210_v2  ;;  %v300_v30 = vld [vmem:[%s3230_s11 + $0x60] sm:$0xff] }
  0x4e   : > { %4948 = vst [vmem:[#allocation27_spill] sm:$0xff] %v3759_v56  ;;  %v3780_v45 = vadd.s32 %v3208_v1, %v446_v62  ;;  %v463_v42 = vadd.s32 360, %v3210_v2  ;;  %v431_v50 = vadd.s32 104, %v3210_v2  ;;  %v396_v38 = vld [vmem:[%s3225_s8 + $0x160] sm:$0xff] }
  0x4f   : > { %943 = vrot.lane.b32.xlu0 %v617_v16, %s3139_s12  ;;  %v3765_v16 = vsel %vm558_vm14, %v299_v5, 0.0  ;;  %vm4916_vm10 = vcmp.lt.s32.totalorder %v3748_v11, 1000  ;;  %v430_v5 = vadd.s32 96, %v3210_v2  ;;  %v3790_v56 = vadd.s32 %v3208_v1, %v462_v20 }
  0x50   : > { %4949 = vst [vmem:[#allocation28_spill] sm:$0xff] %v3765_v16  ;;  %v3774_v52 = vsel %vm4916_vm10, %v348_v28, 0.0  ;;  %v316_v16 = vld [vmem:[%s3230_s11 + $0xe0] sm:$0xff]  ;;  %v618_v28 = vsel %vm554_vm1, %v359_v27, 0.0  ;;  %vm4915_vm15 = vcmp.lt.s32.totalorder %v3780_v45, 1000  ;;  %v3804_v27 = vadd.s32 %v3208_v1, %v447_v24 }
  0x51   : > { %1041 = vrot.lane.b32.xlu1 %v666_v0, %s3139_s12  ;;  %4950 = vst [vmem:[#allocation29_spill] sm:$0xff] %v3774_v52  ;;  %v479_v0 = vadd.s32 488, %v3210_v2  ;;  %v408_v52 = vld [vmem:[%s3225_s8 + $0x1c0] sm:$0xff]  ;;  %v3794_v62 = vadd.s32 %v3208_v1, %v430_v5  ;;  %v3807_v20 = vadd.s32 %v3208_v1, %v463_v42  ;;  %v3812_v5 = vsel %vm4915_vm15, %v316_v16, 0.0 }
  0x52   : > { %4951 = vst [vmem:[#allocation30_spill] sm:$0xff] %v3812_v5  ;;  %vm591_vm0 = vcmp.lt.s32.totalorder %v3790_v56, 1000  ;;  %v480_v24 = vadd.s32 496, %v3210_v2  ;;  %v667_v42 = vsel %vm603_vm4, %v408_v52, 0.0  ;;  %v333_v5 = vld [vmem:[%s3230_s11 + $0x168] sm:$0xff]  ;;  %vm576_vm10 = vcmp.lt.s32.totalorder %v3804_v27, 1000 }
  0x53   : > { %977 = vrot.lane.b32.xlu0 %v634_v23, %s3139_s12  ;;  %v332_v23 = vld [vmem:[%s3230_s11 + $0x160] sm:$0xff]  ;;  %v3801_v25 = vadd.s32 %v3208_v1, %v479_v0  ;;  %vm559_vm1 = vcmp.lt.s32.totalorder %v3794_v62, 1000  ;;  %v349_v0 = vld [vmem:[%s3230_s11 + $0x1e8] sm:$0xff]  ;;  %v3838_v32 = vadd.s32 %v3208_v1, %v431_v50  ;;  %vm4919_vm4 = vcmp.lt.s32.totalorder %v3807_v20, 1000 }
  0x54   : > { %v3829_v16 = vsel %vm559_vm1, %v300_v30, 0.0  ;;  %v301_v52 = vld [vmem:[%s3230_s11 + $0x68] sm:$0xff]  ;;  %v3847_v30 = vsel %vm576_vm10, %v317_v31, 0.0  ;;  %v3855_v43 = vsel %vm4919_vm4, %v333_v5, 0.0  ;;  %v3859_v50 = vadd.s32 %v3208_v1, %v480_v24  ;;  %v350_v31 = vld [vmem:[%s3230_s11 + $0x1f0] sm:$0xff] }
  0x55   : > { %1009 = vrot.lane.b32.xlu1 %v650_v61, %s3139_s12  ;;  %v3825_v61 = vsel %vm591_vm0, %v332_v23, 0.0  ;;  %4953 = vst [vmem:[#allocation32_spill] sm:$0xff] %v3829_v16  ;;  %vm608_vm15 = vcmp.lt.s32.totalorder %v3801_v25, 1000  ;;  %4955 = vst [vmem:[#allocation34_spill] sm:$0xff] %v3847_v30  ;;  %vm4918_vm5 = vcmp.lt.s32.totalorder %v3838_v32, 1000  ;;  %v619_v23 = vsel %vm555_vm6, %v360_v49, 0.0 }
  0x56   : > { %4952 = vst [vmem:[#allocation31_spill] sm:$0xff] %v3825_v61  ;;  %4956 = vst [vmem:[#allocation35_spill] sm:$0xff] %v3855_v43  ;;  %v3867_v47 = vsel %vm4918_vm5, %v301_v52, 0.0  ;;  %v464_v5 = vadd.s32 368, %v3210_v2  ;;  %vm4917_vm3 = vcmp.lt.s32.totalorder %v3859_v50, 1000  ;;  %v432_v24 = vadd.s32 112, %v3210_v2 }
  0x57   : > { %945 = vrot.lane.b32.xlu0 %v618_v28, %s3139_s12  ;;  %v3843_v28 = vsel %vm608_vm15, %v349_v0, 0.0  ;;  %4957 = vst [vmem:[#allocation36_spill] sm:$0xff] %v3867_v47  ;;  %v409_v0 = vld [vmem:[%s3225_s8 + $0x1c8] sm:$0xff]  ;;  %v3879_v49 = vsel %vm4917_vm3, %v350_v31, 0.0  ;;  %v3882_v52 = vadd.s32 %v3208_v1, %v448_v63  ;;  %v318_v47 = vld [vmem:[%s3230_s11 + $0xf0] sm:$0xff]  ;;  %v465_v63 = vadd.s32 376, %v3210_v2 }
  0x58   : > { %4954 = vst [vmem:[#allocation33_spill] sm:$0xff] %v3843_v28  ;;  %4958 = vst [vmem:[#allocation37_spill] sm:$0xff] %v3879_v49  ;;  %v3886_v43 = vadd.s32 %v3208_v1, %v464_v5  ;;  %v334_v30 = vld [vmem:[%s3230_s11 + $0x170] sm:$0xff]  ;;  %v3891_v28 = vadd.s32 %v3208_v1, %v432_v24  ;;  %vm4959_vm6 = vcmp.lt.s32.totalorder %v3617_v59, 1000  ;;  %v351_v24 = vld [vmem:[%s3230_s11 + $0x1f8] sm:$0xff]  ;;  %v655_v44 = vsel %vm591_vm0, %v396_v38, 0.0 }
  0x59   : > { %1043 = vrot.lane.b32.xlu1 %v667_v42, %s3139_s12  ;;  %v481_v42 = vadd.s32 504, %v3210_v2  ;;  %v668_v5 = vsel %vm4959_vm6, %v409_v0, 0.0  ;;  %vm577_vm3 = vcmp.lt.s32.totalorder %v3882_v52, 1000  ;;  %v393_v49 = vld [vmem:[%s3225_s8 + $0x148] sm:$0xff]  ;;  %v3924_v60 = vadd.s32 %v3208_v1, %v465_v63  ;;  %v414_v25 = vld [vmem:[%s3225_s8 + $0x1f0] sm:$0xff]  ;;  %v399_v38 = vld [vmem:[%s3225_s8 + $0x178] sm:$0xff] }
  0x5a   : > { %vm593_vm5 = vcmp.lt.s32.totalorder %v3886_v43, 1000  ;;  %v3913_v61 = vsel %vm577_vm3, %v318_v47, 0.0  ;;  %v361_v0 = vld [vmem:[%s3225_s8 + $0x48] sm:$0xff]  ;;  %vm4920_vm6 = vcmp.lt.s32.totalorder %v3891_v28, 1000  ;;  %v652_v63 = vsel %vm588_vm9, %v393_v49, 0.0  ;;  %v378_v49 = vld [vmem:[%s3225_s8 + $0xd0] sm:$0xff] }
  0x5b   : > { %979 = vrot.lane.b32.xlu0 %v635_v46, %s3139_s12  ;;  %v449_v46 = vadd.s32 248, %v3210_v2  ;;  %v3894_v16 = vadd.s32 %v3208_v1, %v481_v42  ;;  %v433_v42 = vadd.s32 120, %v3210_v2  ;;  %v3917_v59 = vsel %vm593_vm5, %v334_v30, 0.0  ;;  %v397_v56 = vld [vmem:[%s3225_s8 + $0x168] sm:$0xff] }
  0x5c   : > { %v620_v2 = vsel %vm556_vm2, %v361_v0, 0.0  ;;  %vm4960_vm2 = vcmp.lt.s32.totalorder %v3647_v39, 1000  ;;  %v362_v0 = vld [vmem:[%s3225_s8 + $0x50] sm:$0xff]  ;;  %vm1123_vm0 = vcmask 31744  }
  0x5d   : > { %1011 = vrot.lane.b32.xlu1 %v651_v3, %s3139_s12  ;;  %v3897_v31 = vadd.s32 %v3208_v1, %v449_v46  ;;  %v302_v3 = vld [vmem:[%s3230_s11 + $0x70] sm:$0xff]  ;;  %v636_v46 = vsel %vm572_vm8, %v377_v37, 0.0  ;;  %vm610_vm4 = vcmp.lt.s32.totalorder %v3894_v16, 1000  ;;  %v335_v37 = vld [vmem:[%s3230_s11 + $0x178] sm:$0xff] }
  0x5e   : > { %v3930_v47 = vsel %vm4920_vm6, %v302_v3, 0.0  ;;  %v3934_v30 = vsel %vm610_vm4, %v351_v24, 0.0  ;;  %vm594_vm6 = vcmp.lt.s32.totalorder %v3924_v60, 1000  ;;  %v3946_v3 = vadd.s32 %v3208_v1, %v433_v42  ;;  %v303_v24 = vld [vmem:[%s3230_s11 + $0x78] sm:$0xff] }
  0x5f   : > { %947 = vrot.lane.b32.xlu0 %v619_v23, %s3139_s12  ;;  %v319_v23 = vld [vmem:[%s3230_s11 + $0xf8] sm:$0xff]  ;;  %vm578_vm8 = vcmp.lt.s32.totalorder %v3897_v31, 1000  ;;  %v3954_v41 = vsel %vm594_vm6, %v335_v37, 0.0  ;;  %v637_v42 = vsel %vm4960_vm2, %v378_v49, 0.0 }
  0x60   : > { %vm4922_vm9 = vcmp.lt.s32.totalorder %v3946_v3, 1000 }
  0x61   : > { %1045 = vrot.lane.b32.xlu1 %v668_v5, %s3139_s12  ;;  %v3942_v5 = vsel %vm578_vm8, %v319_v23, 0.0  ;;  %v3961_v1 = vsel %vm4922_vm9, %v303_v24, 0.0  ;;  %v394_v23 = vld [vmem:[%s3225_s8 + $0x150] sm:$0xff]  ;;  %vm4961_vm9 = vcmp.lt.s32.totalorder %v3684_v8, 1000  ;;  %v395_v8 = vld [vmem:[%s3225_s8 + $0x158] sm:$0xff] }
  0x62   : > { %v653_v37 = vsel %vm4961_vm9, %v394_v23, 0.0  ;;  %v654_v53 = vsel %vm590_vm11, %v395_v8, 0.0  ;;  %v364_v23 = vld [vmem:[%s3225_s8 + $0x60] sm:$0xff]  ;;  %vm4965_vm11 = vcmp.lt.s32.totalorder %v3807_v20, 1000  ;;  %v398_v8 = vld [vmem:[%s3225_s8 + $0x170] sm:$0xff]  ;;  %vm1693_vm9 = vcmask 261120  }
  0x63   : > { %981 = vrot.lane.b32.xlu0 %v636_v46, %s3139_s12  ;;  %v410_v46 = vld [vmem:[%s3225_s8 + $0x1d0] sm:$0xff]  ;;  %v656_v62 = vsel %vm4965_vm11, %v397_v56, 0.0 }
  0x64   : > { %v669_v36 = vsel %vm605_vm7, %v410_v46, 0.0  ;;  %vm4962_vm7 = vcmp.lt.s32.totalorder %v3705_v10, 1000  ;;  %v363_v46 = vld [vmem:[%s3225_s8 + $0x58] sm:$0xff]  ;;  %v412_v10 = vld [vmem:[%s3225_s8 + $0x1e0] sm:$0xff]  ;;  %v366_v20 = vld [vmem:[%s3225_s8 + $0x70] sm:$0xff] }
  0x65   : > { %1013 = vrot.lane.b32.xlu1 %v652_v63, %s3139_s12  ;;  %v379_v63 = vld [vmem:[%s3225_s8 + $0xd8] sm:$0xff]  ;;  %v670_v39 = vsel %vm4962_vm7, %v411_v57, 0.0  ;;  %v622_v49 = vsel %vm558_vm14, %v363_v46, 0.0  ;;  %v365_v57 = vld [vmem:[%s3225_s8 + $0x68] sm:$0xff]  ;;  %vm4966_vm14 = vcmp.lt.s32.totalorder %v3838_v32, 1000  ;;  %v657_v32 = vsel %vm593_vm5, %v398_v8, 0.0 }
  0x66   : > { %v638_v24 = vsel %vm574_vm13, %v379_v63, 0.0  ;;  %vm4964_vm13 = vcmp.lt.s32.totalorder %v3780_v45, 1000  ;;  %v624_v63 = vsel %vm4966_vm14, %v365_v57, 0.0  ;;  %v320_v46 = vld [vmem:[%s3230_s11 + $0x100] sm:$0xff]  ;;  %vm1188_vm5 = vcmask 39936  }
  0x67   : > { %949 = vrot.lane.b32.xlu0 %v620_v2, %s3139_s12  ;;  %v621_v2 = vsel %vm557_vm12, %v362_v0, 0.0  ;;  %vm4963_vm12 = vcmp.lt.s32.totalorder %v3748_v11, 1000  ;;  %v623_v0 = vsel %vm559_vm1, %v364_v23, 0.0  ;;  %v413_v11 = vld [vmem:[%s3225_s8 + $0x1e8] sm:$0xff]  ;;  %vm4969_vm1 = vcmp.lt.s32.totalorder %v3234_v12, 1000 }
  0x68   : > { %v671_v4 = vsel %vm4963_vm12, %v412_v10, 0.0  ;;  %v672_v45 = vsel %vm608_vm15, %v413_v11, 0.0  ;;  %vm4968_vm15 = vcmp.lt.s32.totalorder %v3891_v28, 1000  ;;  %v383_v10 = vld [vmem:[%s3225_s8 + $0xf8] sm:$0xff]  ;;  %v835_v43 = vsel %vm4969_vm1, %v320_v46, 0.0 }
  0x69   : > { %1047 = vrot.lane.b32.xlu1 %v669_v36, %s3139_s12  ;;  %v380_v36 = vld [vmem:[%s3225_s8 + $0xe0] sm:$0xff]  ;;  %v658_v12 = vsel %vm594_vm6, %v399_v38, 0.0  ;;  %vm1398_vm6 = vcmask 1045504  }
  0x6b   : > { %983 = vrot.lane.b32.xlu0 %v637_v42, %s3139_s12  ;;  %v639_v42 = vsel %vm4964_vm13, %v380_v36, 0.0 }
  0x6d   : > { %1015 = vrot.lane.b32.xlu1 %v653_v37, %s3139_s12  ;;  %v381_v37 = vld [vmem:[%s3225_s8 + $0xe8] sm:$0xff] }
  0x6f   : > { %951 = vrot.lane.b32.xlu0 %v621_v2, %s3139_s12  ;;  %v640_v2 = vsel %vm576_vm10, %v381_v37, 0.0  ;;  %vm4967_vm10 = vcmp.lt.s32.totalorder %v3859_v50, 1000  ;;  %v625_v50 = vsel %vm4968_vm15, %v366_v20, 0.0 }
  0x70   : > { %v673_v27 = vsel %vm4967_vm10, %v414_v25, 0.0 }
  0x71   : > { %1049 = vrot.lane.b32.xlu1 %v670_v39, %s3139_s12  ;;  %v382_v39 = vld [vmem:[%s3225_s8 + $0xf0] sm:$0xff] }
  0x73   : > { %985 = vrot.lane.b32.xlu0 %v638_v24, %s3139_s12  ;;  %v641_v24 = vsel %vm577_vm3, %v382_v39, 0.0  ;;  %vm4971_vm3 = vcmp.lt.s32.totalorder %v3237_v13, 1000 }
  0x75   : > { %1017 = vrot.lane.b32.xlu1 %v654_v53, %s3139_s12 }
  0x77   : > { %953 = vrot.lane.b32.xlu0 %v622_v49, %s3139_s12  ;;  %v415_v49 = vld [vmem:[%s3225_s8 + $0x1f8] sm:$0xff] }
  0x79   : > { %1051 = vrot.lane.b32.xlu1 %v671_v4, %s3139_s12  ;;  %v674_v4 = vsel %vm610_vm4, %v415_v49, 0.0  ;;  %vm4970_vm4 = vcmp.lt.s32.totalorder %v3946_v3, 1000 }
  0x7b   : > { %987 = vrot.lane.b32.xlu0 %v639_v42, %s3139_s12  ;;  %v642_v42 = vsel %vm578_vm8, %v383_v10, 0.0  ;;  %v336_v10 = vld [vmem:[%s3230_s11 + $0x180] sm:$0xff]  ;;  %vm1385_vm8 = vcmask 48128  }
  0x7d   : > { %1019 = vrot.lane.b32.xlu1 %v655_v44, %s3139_s12  ;;  %v367_v44 = vld [vmem:[%s3225_s8 + $0x78] sm:$0xff] }
  0x7e   : > { %v626_v16 = vsel %vm4970_vm4, %v367_v44, 0.0 }
  0x7f   : > { %955 = vrot.lane.b32.xlu0 %v623_v0, %s3139_s12 }
  0x81   : > { %1053 = vrot.lane.b32.xlu1 %v672_v45, %s3139_s12 }
  0x83   : > { %989 = vrot.lane.b32.xlu0 %v640_v2, %s3139_s12 }
  0x85   : > { %1021 = vrot.lane.b32.xlu1 %v656_v62, %s3139_s12 }
  0x87   : > { %957 = vrot.lane.b32.xlu0 %v624_v63, %s3139_s12 }
  0x89   : > { %1055 = vrot.lane.b32.xlu1 %v673_v27, %s3139_s12 }
  0x8b   : > { %991 = vrot.lane.b32.xlu0 %v641_v24, %s3139_s12  ;;  %v932_v53 = vpop.permute.xlu1 %931 }
  0x8c   : > { %v4045_v36 = vsel %vm1123_vm0, %v3248_v22, %v932_v53 }
  0x8d   : > { %v964_v52 = vpop.permute.xlu0 %963  ;;  %1023 = vrot.lane.b32.xlu1 %v657_v32, %s3139_s12 }
  0x8e   : > { %v1140_v46 = vsel %vm1123_vm0, %v3254_v26, %v964_v52  ;;  %v851_v26 = vsel %vm4971_vm3, %v336_v10, 0.0  ;;  %v4977_v10 = vld [vmem:[#allocation10_spill] sm:$0xff] }
  0x8f   : > { %959 = vrot.lane.b32.xlu0 %v625_v50, %s3139_s12  ;;  %v996_v28 = vpop.permute.xlu1 %995 }
  0x90   : > { %v4058_v22 = vsel %vm1123_vm0, %v835_v43, %v996_v28 }
  0x91   : > { %v1028_v23 = vpop.permute.xlu0 %1027  ;;  %1057 = vrot.lane.b32.xlu1 %v674_v4, %s3139_s12 }
  0x92   : > { %v1172_v28 = vsel %vm1123_vm0, %v851_v26, %v1028_v23 }
  0x93   : > { %993 = vrot.lane.b32.xlu0 %v642_v42, %s3139_s12  ;;  %v1030_v0 = vpop.permute.xlu1 %1029 }
  0x94   : > { %v1173_v13 = vsel %vm1123_vm0, %v3266_v33, %v1030_v0 }
  0x95   : > { %v966_v11 = vpop.permute.xlu0 %965  ;;  %1025 = vrot.lane.b32.xlu1 %v658_v12, %s3139_s12 }
  0x96   : > { %v1141_v50 = vsel %vm1123_vm0, %v3269_v34, %v966_v11 }
  0x97   : > { %961 = vrot.lane.b32.xlu0 %v626_v16, %s3139_s12  ;;  %v998_v31 = vpop.permute.xlu1 %997  ;;  %v1206_v43 = vsel %vm1188_vm5, %v1141_v50, 1.0  ;;  %v1238_v16 = vsel %vm1188_vm5, %v1173_v13, 1.0  ;;  %v4979_v13 = vld [vmem:[#allocation14_spill] sm:$0xff] }
  0x98   : > { %v4070_v37 = vsel %vm1123_vm0, %v3278_v40, %v998_v31 }
  0x99   : > { %v4072_v45 = vpop.permute.xlu0 %933 }
  0x9b   : > { %v1032_v2 = vpop.permute.xlu1 %1031 }
  0x9c   : > { %v1174_v23 = vsel %vm1123_vm0, %v3303_v58, %v1032_v2 }
  0x9d   : > { %v968_v56 = vpop.permute.xlu0 %967 }
  0x9e   : > { %v1142_v52 = vsel %vm1123_vm0, %v3323_v6, %v968_v56 }
  0x9f   : > { %v1000_v60 = vpop.permute.xlu1 %999  ;;  %v1207_v38 = vsel %vm1188_vm5, %v1142_v52, 1.0 }
  0xa0   : > { %v4076_v57 = vsel %vm1123_vm0, %v3326_v7, %v1000_v60  ;;  %v1239_v60 = vsel %vm1188_vm5, %v1174_v23, 1.0 }
  0xa1   : > { %v936_v3 = vpop.permute.xlu0 %935 }
  0xa2   : > { %v4080_v62 = vsel %vm1123_vm0, %v3330_v9, %v936_v3 }
  0xa3   : > { %v1034_v63 = vpop.permute.xlu1 %1033 }
  0xa4   : > { %v1175_v58 = vsel %vm1123_vm0, %v3339_v14, %v1034_v63 }
  0xa5   : > { %v970_v25 = vpop.permute.xlu0 %969 }
  0xa6   : > { %v1143_v6 = vsel %vm1123_vm0, %v3343_v15, %v970_v25  ;;  %v4972_v25 = vld [vmem:[#allocation5_spill] sm:$0xff] }
  0xa7   : > { %v1002_v39 = vpop.permute.xlu1 %1001 }
  0xa8   : > { %v4084_v40 = vsel %vm1123_vm0, %v3354_v21, %v1002_v39 }
  0xa9   : > { %v938_v27 = vpop.permute.xlu0 %937 }
  0xaa   : > { %v4088_v24 = vsel %vm1123_vm0, %v3394_v48, %v938_v27  ;;  %v1205_v48 = vsel %vm1188_vm5, %v1140_v46, 1.0  ;;  %v4973_v27 = vld [vmem:[#allocation8_spill] sm:$0xff] }
  0xab   : > { %v1036_v7 = vpop.permute.xlu1 %1035 }
  0xac   : > { %v1176_v39 = vsel %vm1123_vm0, %v4972_v25, %v1036_v7  ;;  %v4976_v7 = vld [vmem:[#allocation6_spill] sm:$0xff]  ;;  %v4985_v25 = vld [vmem:[#allocation19_spill] sm:$0xff] }
  0xad   : > { %v972_v8 = vpop.permute.xlu0 %971  ;;  %v1241_v50 = vsel %vm1188_vm5, %v1176_v39, 1.0 }
  0xae   : > { %v1144_v11 = vsel %vm1123_vm0, %v3404_v51, %v972_v8 }
  0xaf   : > { %v1004_v20 = vpop.permute.xlu1 %1003  ;;  %v1209_v56 = vsel %vm1188_vm5, %v1144_v11, 1.0 }
  0xb0   : > { %v4092_v9 = vsel %vm1123_vm0, %v3414_v54, %v1004_v20  ;;  %v4974_v20 = vld [vmem:[#allocation11_spill] sm:$0xff] }
  0xb1   : > { %v940_v32 = vpop.permute.xlu0 %939 }
  0xb2   : > { %v4098_v21 = vsel %vm1123_vm0, %v3418_v55, %v940_v32 }
  0xb3   : > { %v1038_v53 = vpop.permute.xlu1 %1037 }
  0xb5   : > { %v974_v49 = vpop.permute.xlu0 %973  ;;  %1285 = vxpose.xlu0.b32.start [1/16] (narrow) %v1205_v48, 8 }
  0xb6   : > { %v1145_v51 = vsel %vm1123_vm0, %v3453_v18, %v974_v49  ;;  %v4975_v18 = vld [vmem:[#allocation12_spill] sm:$0xff]  ;;  %v1177_v49 = vsel %vm1123_vm0, %v4976_v7, %v1038_v53 }
  0xb7   : > { %v1006_v54 = vpop.permute.xlu1 %1005  ;;  %v1210_v3 = vsel %vm1188_vm5, %v1145_v51, 1.0 }
  0xb8   : > { %v4111_v55 = vsel %vm1123_vm0, %v3457_v19, %v1006_v54  ;;  %v1237_v19 = vsel %vm1188_vm5, %v1172_v28, 1.0  ;;  %v4978_v28 = vld [vmem:[#allocation7_spill] sm:$0xff] }
  0xb9   : > { %v942_v4 = vpop.permute.xlu0 %941  ;;  %1286 = vxpose.xlu0.b32.cont [2/16] (narrow) %v1206_v43, 8 }
  0xba   : > { %v4115_v34 = vsel %vm1123_vm0, %v3478_v35, %v942_v4  ;;  %v1208_v35 = vsel %vm1188_vm5, %v1143_v6, 1.0  ;;  %v1242_v4 = vsel %vm1188_vm5, %v1177_v49, 1.0 }
  0xbb   : > { %v1040_v42 = vpop.permute.xlu1 %1039 }
  0xbd   : > { %v976_v44 = vpop.permute.xlu0 %975  ;;  %1287 = vxpose.xlu0.b32.cont [3/16] (narrow) %v1207_v38, 8  ;;  %v1178_v38 = vsel %vm1123_vm0, %v4978_v28, %v1040_v42  ;;  %v4982_v42 = vld [vmem:[#allocation9_spill] sm:$0xff] }
  0xbe   : > { %1349 = vxpose.xlu1.b32.start [1/16] (narrow) %v1237_v19, 8  ;;  %v1146_v8 = vsel %vm1123_vm0, %v4973_v27, %v976_v44  ;;  %v4980_v44 = vld [vmem:[#allocation15_spill] sm:$0xff]  ;;  %v1243_v11 = vsel %vm1188_vm5, %v1178_v38, 1.0 }
  0xbf   : > { %v1008_v12 = vpop.permute.xlu1 %1007  ;;  %v1211_v48 = vsel %vm1188_vm5, %v1146_v8, 1.0 }
  0xc0   : > { %v4132_v33 = vsel %vm1123_vm0, %v3504_v29, %v1008_v12  ;;  %v4981_v12 = vld [vmem:[#allocation16_spill] sm:$0xff] }
  0xc1   : > { %v944_v15 = vpop.permute.xlu0 %943  ;;  %1288 = vxpose.xlu0.b32.cont [4/16] (narrow) %v1208_v35, 8 }
  0xc2   : > { %v4136_v0 = vsel %vm1123_vm0, %v3531_v17, %v944_v15  ;;  %1350 = vxpose.xlu1.b32.cont [2/16] (narrow) %v1238_v16, 8  ;;  %v1240_v17 = vsel %vm1188_vm5, %v1175_v58, 1.0 }
  0xc3   : > { %v1042_v31 = vpop.permute.xlu1 %1041 }
  0xc4   : > { %v1179_v15 = vsel %vm1123_vm0, %v4982_v42, %v1042_v31 }
  0xc5   : > { %v978_v29 = vpop.permute.xlu0 %977  ;;  %1289 = vxpose.xlu0.b32.cont [5/16] (narrow) %v1209_v56, 8 }
  0xc6   : > { %1351 = vxpose.xlu1.b32.cont [3/16] (narrow) %v1239_v60, 8  ;;  %v1147_v54 = vsel %vm1123_vm0, %v4977_v10, %v978_v29  ;;  %v4983_v60 = vld [vmem:[#allocation18_spill] sm:$0xff]  ;;  %v4988_v10 = vld [vmem:[#allocation21_spill] sm:$0xff] }
  0xc7   : > { %v1010_v2 = vpop.permute.xlu1 %1009  ;;  %v1212_v52 = vsel %vm1188_vm5, %v1147_v54, 1.0 }
  0xc8   : > { %v4152_v14 = vsel %vm1123_vm0, %v4974_v20, %v1010_v2  ;;  %v1244_v2 = vsel %vm1188_vm5, %v1179_v15, 1.0  ;;  %v4986_v20 = vld [vmem:[#allocation17_spill] sm:$0xff]  ;;  %v4993_v15 = vld [vmem:[#allocation27_spill] sm:$0xff] }
  0xc9   : > { %v946_v63 = vpop.permute.xlu0 %945  ;;  %1290 = vxpose.xlu0.b32.cont [6/16] (narrow) %v1210_v3, 8  ;;  %v4984_v3 = vld [vmem:[#allocation13_spill] sm:$0xff] }
  0xca   : > { %v4156_v32 = vsel %vm1123_vm0, %v4975_v18, %v946_v63  ;;  %1352 = vxpose.xlu1.b32.cont [4/16] (narrow) %v1240_v17, 8 }
  0xcb   : > { %v1044_v46 = vpop.permute.xlu1 %1043 }
  0xcc   : > { %v1180_v17 = vsel %vm1123_vm0, %v4984_v3, %v1044_v46 }
  0xcd   : > { %v980_v43 = vpop.permute.xlu0 %979  ;;  %1291 = vxpose.xlu0.b32.cont [7/16] (narrow) %v1211_v48, 8  ;;  %v1245_v8 = vsel %vm1188_vm5, %v1180_v17, 1.0  ;;  %v4987_v48 = vld [vmem:[#allocation22_spill] sm:$0xff] }
  0xce   : > { %1353 = vxpose.xlu1.b32.cont [5/16] (narrow) %v1241_v50, 8  ;;  %v1148_v6 = vsel %vm1123_vm0, %v4979_v13, %v980_v43  ;;  %v4989_v43 = vld [vmem:[#allocation23_spill] sm:$0xff] }
  0xcf   : > { %v1012_v26 = vpop.permute.xlu1 %1011  ;;  %v1213_v23 = vsel %vm1188_vm5, %v1148_v6, 1.0  ;;  %v4991_v6 = vld [vmem:[#allocation25_spill] sm:$0xff] }
  0xd0   : > { %v4172_v53 = vsel %vm1123_vm0, %v4980_v44, %v1012_v26 }
  0xd1   : > { %v948_v19 = vpop.permute.xlu0 %947  ;;  %1292 = vxpose.xlu0.b32.cont [8/16] (narrow) %v1212_v52, 8 }
  0xd2   : > { %v4176_v35 = vsel %vm1123_vm0, %v4981_v12, %v948_v19  ;;  %1354 = vxpose.xlu1.b32.cont [6/16] (narrow) %v1242_v4, 8  ;;  %v4990_v4 = vld [vmem:[#allocation24_spill] sm:$0xff]  ;;  %v4992_v12 = vld [vmem:[#allocation26_spill] sm:$0xff] }
  0xd3   : > { %v1046_v16 = vpop.permute.xlu1 %1045 }
  0xd4   : > { %v1181_v63 = vsel %vm1123_vm0, %v4986_v20, %v1046_v16 }
  0xd5   : > { %v982_v56 = vpop.permute.xlu0 %981  ;;  %1293 = vxpose.xlu0.b32.cont [9/16] (narrow) %v1213_v23, 8  ;;  %v1246_v49 = vsel %vm1188_vm5, %v1181_v63, 1.0 }
  0xd6   : > { %v1149_v58 = vsel %vm1123_vm0, %v4983_v60, %v982_v56  ;;  %1355 = vxpose.xlu1.b32.cont [7/16] (narrow) %v1243_v11, 8 }
  0xd7   : > { %v1214_v51 = vsel %vm1188_vm5, %v1149_v58, 1.0  ;;  %v1014_v29 = vpop.permute.xlu1 %1013  ;;  %v4994_v58 = vld [vmem:[#allocation28_spill] sm:$0xff] }
  0xd8   : > { %v4190_v39 = vsel %vm1123_vm0, %v4985_v25, %v1014_v29  ;;  %v4996_v25 = vld [vmem:[#allocation30_spill] sm:$0xff] }
  0xd9   : > { %v4192_v27 = vpop.permute.xlu0 %949  ;;  %1294 = vxpose.xlu0.b32.cont [10/16] (narrow) %v1214_v51, 8 }
  0xda   : > { %1356 = vxpose.xlu1.b32.cont [8/16] (narrow) %v1244_v2, 8  ;;  %v4995_v2 = vld [vmem:[#allocation29_spill] sm:$0xff] }
  0xdb   : > { %v1048_v31 = vpop.permute.xlu1 %1047 }
  0xdc   : > { %v1182_v54 = vsel %vm1123_vm0, %v4988_v10, %v1048_v31  ;;  %v4999_v10 = vld [vmem:[#allocation33_spill] sm:$0xff] }
  0xdd   : > { %v984_v18 = vpop.permute.xlu0 %983  ;;  %v1247_v13 = vsel %vm1188_vm5, %v1182_v54, 1.0 }
  0xde   : > { %v1150_v50 = vsel %vm1123_vm0, %v4987_v48, %v984_v18  ;;  %1357 = vxpose.xlu1.b32.cont [9/16] (narrow) %v1245_v8, 8  ;;  %v4997_v18 = vld [vmem:[#allocation31_spill] sm:$0xff] }
  0xdf   : > { %v1215_v46 = vsel %vm1188_vm5, %v1150_v50, 1.0  ;;  %v1016_v7 = vpop.permute.xlu1 %1015 }
  0xe0   : > { %1295 = vxpose.xlu0.b32.cont [11/16] (narrow) %v1215_v46, 8  ;;  %v4205_v26 = vsel %vm1123_vm0, %v4989_v43, %v1016_v7  ;;  %v4998_v46 = vld [vmem:[#allocation32_spill] sm:$0xff] }
  0xe1   : > { %v952_v52 = vpop.permute.xlu0 %951 }
  0xe2   : > { %v4209_v28 = vsel %vm1123_vm0, %v4990_v4, %v952_v52  ;;  %1358 = vxpose.xlu1.b32.cont [10/16] (narrow) %v1246_v49, 8  ;;  %v5000_v52 = vld [vmem:[#allocation34_spill] sm:$0xff] }
  0xe3   : > { %v1050_v38 = vpop.permute.xlu1 %1049 }
  0xe4   : > { %v1183_v44 = vsel %vm1123_vm0, %v4991_v6, %v1050_v38 }
  0xe5   : > { %v986_v19 = vpop.permute.xlu0 %985  ;;  %v1248_v42 = vsel %vm1188_vm5, %v1183_v44, 1.0  ;;  %v5001_v44 = vld [vmem:[#allocation35_spill] sm:$0xff] }
  0xe6   : > { %v1151_v16 = vsel %vm1123_vm0, %v4992_v12, %v986_v19  ;;  %1359 = vxpose.xlu1.b32.cont [11/16] (narrow) %v1247_v13, 8 }
  0xe7   : > { %v1216_v23 = vsel %vm1188_vm5, %v1151_v16, 1.0  ;;  %v1018_v11 = vpop.permute.xlu1 %1017  ;;  %v5002_v16 = vld [vmem:[#allocation36_spill] sm:$0xff] }
  0xe8   : > { %1296 = vxpose.xlu0.b32.cont [12/16] (narrow) %v1216_v23, 8  ;;  %v4220_v56 = vsel %vm1123_vm0, %v4993_v15, %v1018_v11 }
  0xe9   : > { %v954_v60 = vpop.permute.xlu0 %953 }
  0xea   : > { %v4224_v51 = vsel %vm1123_vm0, %v4994_v58, %v954_v60  ;;  %1360 = vxpose.xlu1.b32.cont [12/16] (narrow) %v1248_v42, 8  ;;  %v5003_v42 = vld [vmem:[#allocation37_spill] sm:$0xff] }
  0xeb   : > { %v1052_v29 = vpop.permute.xlu1 %1051 }
  0xec   : > { %v1184_v3 = vsel %vm1123_vm0, %v4995_v2, %v1052_v29 }
  0xed   : > { %v988_v17 = vpop.permute.xlu0 %987  ;;  %v1249_v8 = vsel %vm1188_vm5, %v1184_v3, 1.0 }
  0xee   : > { %v1152_v31 = vsel %vm1123_vm0, %v4996_v25, %v988_v17  ;;  %1361 = vxpose.xlu1.b32.cont [13/16] (narrow) %v1249_v8, 8 }
  0xef   : > { %v1217_v20 = vsel %vm1188_vm5, %v1152_v31, 1.0  ;;  %v1020_v63 = vpop.permute.xlu1 %1019 }
  0xf0   : > { %1297 = vxpose.xlu0.b32.cont [13/16] (narrow) %v1217_v20, 8  ;;  %v4234_v48 = vsel %vm1123_vm0, %v4997_v18, %v1020_v63 }
  0xf1   : > { %v956_v50 = vpop.permute.xlu0 %955 }
  0xf2   : > { %v4238_v7 = vsel %vm1123_vm0, %v4998_v46, %v956_v50 }
  0xf3   : > { %v1054_v49 = vpop.permute.xlu1 %1053 }
  0xf4   : > { %v1185_v54 = vsel %vm1123_vm0, %v4999_v10, %v1054_v49  ;;  %v1222_v49 = vsel %vm1188_vm5, %v4070_v37, 1.0  ;;  %v1225_v37 = vsel %vm1188_vm5, %v4092_v9, 1.0  ;;  %v1195_v9 = vsel %vm1188_vm5, %v4136_v0, 1.0 }
  0xf5   : > { %v990_v43 = vpop.permute.xlu0 %989  ;;  %v1250_v38 = vsel %vm1188_vm5, %v1185_v54, 1.0  ;;  %v1223_v54 = vsel %vm1188_vm5, %v4076_v57, 1.0  ;;  %v1193_v57 = vsel %vm1188_vm5, %v4098_v21, 1.0  ;;  %v1228_v21 = vsel %vm1188_vm5, %v4152_v14, 1.0 }
  0xf6   : > { %v1153_v4 = vsel %vm1123_vm0, %v5000_v52, %v990_v43  ;;  %1362 = vxpose.xlu1.b32.cont [14/16] (narrow) %v1250_v38, 8  ;;  %v5005_v43 = vld [vmem:[#allocation20_spill] sm:$0xff]  ;;  %v1230_v14 = vsel %vm1188_vm5, %v4190_v39, 1.0  ;;  %v1233_v39 = vsel %vm1188_vm5, %v4234_v48, 1.0 }
  0xf7   : > { %v1218_v13 = vsel %vm1188_vm5, %v1153_v4, 1.0  ;;  %v1022_v6 = vpop.permute.xlu1 %1021  ;;  %v1133_v0 = vsel %vm1123_vm0, %v5005_v43, %v4192_v27  ;;  %v1200_v27 = vsel %vm1188_vm5, %v4224_v51, 1.0 }
  0xf8   : > { %1298 = vxpose.xlu0.b32.cont [14/16] (narrow) %v1218_v13, 8  ;;  %v4248_v19 = vsel %vm1123_vm0, %v5001_v44, %v1022_v6  ;;  %v1198_v52 = vsel %vm1188_vm5, %v1133_v0, 1.0 }
  0xf9   : > { %v958_v12 = vpop.permute.xlu0 %957 }
  0xfa   : > { %v4252_v23 = vsel %vm1123_vm0, %v5002_v16, %v958_v12 }
  0xfb   : > { %v1056_v11 = vpop.permute.xlu1 %1055 }
  0xfc   : > { %v1186_v15 = vsel %vm1123_vm0, %v5003_v42, %v1056_v11  ;;  %v1383_v11 = vld [vmem:[%s4905_s2 + $0x10] sm:$0xff]  ;;  %v1384_v42 = vld [vmem:[%s4905_s2 + $0x18] sm:$0xff] }
  0xfd   : > { %v992_v60 = vpop.permute.xlu0 %991  ;;  %v1251_v29 = vsel %vm1188_vm5, %v1186_v15, 1.0  ;;  %v4389_v15 = vld [vmem:[%s4906_s3 + $0x10] sm:$0xff] }
  0xfe   : > { %v1154_v58 = vsel %vm1123_vm0, %v3913_v61, %v992_v60  ;;  %1363 = vxpose.xlu1.b32.cont [15/16] (narrow) %v1251_v29, 8  ;;  %v4394_v60 = vld [vmem:[%s4906_s3 + $0x18] sm:$0xff]  ;;  %v4401_v29 = vld [vmem:[%s4906_s3] sm:$0xff] }
  0xff   : > { %v1219_v2 = vsel %vm1188_vm5, %v1154_v58, 1.0  ;;  %v1024_v3 = vpop.permute.xlu1 %1023  ;;  %v3141_v58 = vmov 32  }
 0x100   : > { %1299 = vxpose.xlu0.b32.cont [15/16] (narrow) %v1219_v2, 8  ;;  %v4262_v17 = vsel %vm1123_vm0, %v3917_v59, %v1024_v3  ;;  %v3140_v59 = vmov 0.0   ;;  %v4406_v2 = vld [vmem:[%s4906_s3 + $0x8] sm:$0xff]  ;;  %v4413_v3 = vld [vmem:[%s4907_s4] sm:$0xf] }
 0x101   : > { %v960_v25 = vpop.permute.xlu0 %959  ;;  %1564 = vmatprep.mubr.f32.mxu1 %v3140_v59  ;;  %1475 = vmatprep.mubr.f32.mxu0 %v3140_v59  ;;  %v1235_v51 = vsel %vm1188_vm5, %v4262_v17, 1.0 }
 0x102   : > { %v4266_v31 = vsel %vm1123_vm0, %v3930_v47, %v960_v25  ;;  %v1221_v47 = vsel %vm1188_vm5, %v4058_v22, 1.0  ;;  %v1191_v22 = vsel %vm1188_vm5, %v4080_v62, 1.0  ;;  %v1226_v62 = vsel %vm1188_vm5, %v4111_v55, 1.0 }
 0x103   : > { %v1058_v8 = vpop.permute.xlu1 %1057  ;;  %v1196_v55 = vsel %vm1188_vm5, %v4156_v32, 1.0  ;;  %v1231_v32 = vsel %vm1188_vm5, %v4205_v26, 1.0  ;;  %v1201_v26 = vsel %vm1188_vm5, %v4238_v7, 1.0  ;;  %v1203_v7 = vsel %vm1188_vm5, %v4266_v31, 1.0 }
 0x104   : > { %v1187_v61 = vsel %vm1123_vm0, %v3934_v30, %v1058_v8  ;;  %v1189_v30 = vsel %vm1188_vm5, %v4045_v36, 1.0  ;;  %v1224_v36 = vsel %vm1188_vm5, %v4084_v40, 1.0  ;;  %v1194_v40 = vsel %vm1188_vm5, %v4115_v34, 1.0 }
 0x105   : > { %v994_v20 = vpop.permute.xlu0 %993  ;;  %v1252_v18 = vsel %vm1188_vm5, %v1187_v61, 1.0  ;;  %v1229_v34 = vsel %vm1188_vm5, %v4172_v53, 1.0  ;;  %v1199_v53 = vsel %vm1188_vm5, %v4209_v28, 1.0  ;;  %v1234_v28 = vsel %vm1188_vm5, %v4248_v19, 1.0 }
 0x106   : > { %v1155_v63 = vsel %vm1123_vm0, %v3942_v5, %v994_v20  ;;  %1364 = vxpose.xlu1.b32.end [16/16] (narrow) %v1252_v18, 8  ;;  %v5004_v5 = vld [vmem:[#allocation4_spill] sm:$0xff] }
 0x107   : > { %v1220_v50 = vsel %vm1188_vm5, %v1155_v63, 1.0  ;;  %v1125_v46 = vsel %vm1123_vm0, %v5004_v5, %v4072_v45  ;;  %v1192_v45 = vsel %vm1188_vm5, %v4088_v24, 1.0  ;;  %v1227_v24 = vsel %vm1188_vm5, %v4132_v33, 1.0  ;;  %v1026_v4 = vpop.permute.xlu1 %1025 }
 0x108   : > { %1300 = vxpose.xlu0.b32.end [16/16] (narrow) %v1220_v50, 8  ;;  %v1190_v10 = vsel %vm1188_vm5, %v1125_v46, 1.0  ;;  %v1197_v33 = vsel %vm1188_vm5, %v4176_v35, 1.0  ;;  %v1232_v35 = vsel %vm1188_vm5, %v4220_v56, 1.0  ;;  %v1202_v56 = vsel %vm1188_vm5, %v4252_v23, 1.0  ;;  %v1382_v23 = vld [vmem:[%s4905_s2 + $0x8] sm:$0xff] }
 0x109   : > { %v962_v38 = vpop.permute.xlu0 %961  ;;  %v1171_v48 = vsel %vm1123_vm0, %v3954_v41, %v1026_v4  ;;  %v1381_v41 = vld [vmem:[%s4905_s2] sm:$0xff] }
 0x10a   : > { %1317 = vxpose.xlu1.b32.start [1/16] (narrow) %v1221_v47, 8  ;;  %v1139_v13 = vsel %vm1123_vm0, %v3961_v1, %v962_v38  ;;  %v1236_v6 = vsel %vm1188_vm5, %v1171_v48, 1.0 }
 0x10b   : > { %v1204_v44 = vsel %vm1188_vm5, %v1139_v13, 1.0 }
 0x10c   : > { %1253 = vxpose.xlu0.b32.start [1/16] (narrow) %v1189_v30, 8 }
 0x10e   : > { %1318 = vxpose.xlu1.b32.cont [2/16] (narrow) %v1222_v49, 8 }
 0x110   : > { %1254 = vxpose.xlu0.b32.cont [2/16] (narrow) %v1190_v10, 8 }
 0x112   : > { %1319 = vxpose.xlu1.b32.cont [3/16] (narrow) %v1223_v54, 8 }
 0x114   : > { %1255 = vxpose.xlu0.b32.cont [3/16] (narrow) %v1191_v22, 8 }
 0x116   : > { %1320 = vxpose.xlu1.b32.cont [4/16] (narrow) %v1224_v36, 8 }
 0x118   : > { %1256 = vxpose.xlu0.b32.cont [4/16] (narrow) %v1192_v45, 8 }
 0x11a   : > { %1321 = vxpose.xlu1.b32.cont [5/16] (narrow) %v1225_v37, 8 }
 0x11c   : > { %1257 = vxpose.xlu0.b32.cont [5/16] (narrow) %v1193_v57, 8 }
 0x11e   : > { %1322 = vxpose.xlu1.b32.cont [6/16] (narrow) %v1226_v62, 8 }
 0x120   : > { %1258 = vxpose.xlu0.b32.cont [6/16] (narrow) %v1194_v40, 8 }
 0x122   : > { %1323 = vxpose.xlu1.b32.cont [7/16] (narrow) %v1227_v24, 8 }
 0x124   : > { %1259 = vxpose.xlu0.b32.cont [7/16] (narrow) %v1195_v9, 8 }
 0x126   : > { %1324 = vxpose.xlu1.b32.cont [8/16] (narrow) %v1228_v21, 8 }
 0x128   : > { %1260 = vxpose.xlu0.b32.cont [8/16] (narrow) %v1196_v55, 8 }
 0x12a   : > { %1325 = vxpose.xlu1.b32.cont [9/16] (narrow) %v1229_v34, 8 }
 0x12c   : > { %1261 = vxpose.xlu0.b32.cont [9/16] (narrow) %v1197_v33, 8 }
 0x12e   : > { %1326 = vxpose.xlu1.b32.cont [10/16] (narrow) %v1230_v14, 8 }
 0x130   : > { %1262 = vxpose.xlu0.b32.cont [10/16] (narrow) %v1198_v52, 8 }
 0x132   : > { %1327 = vxpose.xlu1.b32.cont [11/16] (narrow) %v1231_v32, 8 }
 0x134   : > { %1263 = vxpose.xlu0.b32.cont [11/16] (narrow) %v1199_v53, 8 }
 0x136   : > { %1328 = vxpose.xlu1.b32.cont [12/16] (narrow) %v1232_v35, 8 }
 0x138   : > { %1264 = vxpose.xlu0.b32.cont [12/16] (narrow) %v1200_v27, 8 }
 0x13a   : > { %1329 = vxpose.xlu1.b32.cont [13/16] (narrow) %v1233_v39, 8 }
 0x13c   : > { %1265 = vxpose.xlu0.b32.cont [13/16] (narrow) %v1201_v26, 8 }
 0x13e   : > { %1330 = vxpose.xlu1.b32.cont [14/16] (narrow) %v1234_v28, 8 }
 0x140   : > { %1266 = vxpose.xlu0.b32.cont [14/16] (narrow) %v1202_v56, 8 }
 0x142   : > { %1331 = vxpose.xlu1.b32.cont [15/16] (narrow) %v1235_v51, 8 }
 0x144   : > { %1267 = vxpose.xlu0.b32.cont [15/16] (narrow) %v1203_v7, 8 }
 0x146   : > { %1332 = vxpose.xlu1.b32.end [16/16] (narrow) %v1236_v6, 8  ;;  %v4346_v19 = vpop.trf.xlu1 }
 0x147   : > { %2850 = vmatprep.subr.msk.mxu1 %vm1398_vm6, %v4346_v19 }
 0x148   : > { %1268 = vxpose.xlu0.b32.end [16/16] (narrow) %v1204_v44, 8  ;;  %v4348_v12 = vpop.trf.xlu0 }
 0x149   : > { %2844 = vmatprep.subr.msk.mxu0 %vm1398_vm6, %v4348_v12 }
 0x164   : > { %2978 = vset.pattern.permute.xlu1 %v3141_v58 }
 0x165   : > { %1685 = vperm.xlu1 %2978, %v4389_v15  }
 0x169   : > { %1675 = vperm.xlu1 %2978, %v4401_v29  }
 0x171   : > { %2977 = vset.pattern.permute.xlu0 %v3141_v58 }
 0x172   : > { %1690 = vperm.xlu0 %2977, %v4394_v60  }
 0x176   : > { %1680 = vperm.xlu0 %2977, %v4406_v2  }
 0x17a   : > { %1963 = vperm.xlu0 %2977, %v4413_v3  }
 0x186   : > { %v4355_v1 = vpop.trf.xlu1 }
 0x187   : > { %2851 = vmatpush1.msk.msra.mxu1 %vm1398_vm6, %v4355_v1 }
 0x188   : > { %v4358_v16 = vpop.trf.xlu0  ;;  %2852 = vmatmul.mubr.msk.f32.vlgmr.msra.gmra.mxu1 %vm1385_vm8, %v1381_v41 }
 0x189   : > { %2845 = vmatpush1.msk.msra.mxu0 %vm1398_vm6, %v4358_v16  ;;  %1570 = vmatprep.mubr.f32.mxu1 %v3140_v59 }
 0x18a   : > { %2846 = vmatmul.mubr.msk.f32.vlgmr.msra.gmra.mxu0 %vm1385_vm8, %v1381_v41 }
 0x18b   : > { %1481 = vmatprep.mubr.f32.mxu0 %v3140_v59 }
 0x18c   : > { %2853 = vmatmul.mubr.msk.f32.gmra.mxu1 %vm1385_vm8, %v1382_v23 }
 0x18d   : > { %1576 = vmatprep.mubr.f32.mxu1 %v3140_v59 }
 0x18e   : > { %2847 = vmatmul.mubr.msk.f32.gmra.mxu0 %vm1385_vm8, %v1382_v23 }
 0x18f   : > { %1487 = vmatprep.mubr.f32.mxu0 %v3140_v59 }
 0x190   : > { %2854 = vmatmul.mubr.msk.f32.gmra.mxu1 %vm1385_vm8, %v1383_v11 }
 0x191   : > { %1582 = vmatprep.mubr.f32.mxu1 %v3140_v59 }
 0x192   : > { %2848 = vmatmul.mubr.msk.f32.gmra.mxu0 %vm1385_vm8, %v1383_v11 }
 0x193   : > { %1493 = vmatprep.mubr.f32.mxu0 %v3140_v59 }
 0x194   : > { %2855 = vmatmul.mubr.msk.f32.gmra.mxu1 %vm1385_vm8, %v1384_v42 }
 0x195   : > { %1855 = vmatprep.mubr.f32.mxu1 %v3140_v59 }
 0x196   : > { %2849 = vmatmul.mubr.msk.f32.gmra.mxu0 %vm1385_vm8, %v1384_v42 }
 0x197   : > { %1766 = vmatprep.mubr.f32.mxu0 %v3140_v59 }
 0x248   : > { %v4416_v17 = vpop.f32.mrf.mxu1 }
 0x249   : > { %v1591_v25 = vmul.f32 0.5, %v4416_v17 }
 0x24a   : > { %v4419_v31 = vpop.f32.mrf.mxu0  ;;  %v4422_v61 = vpop.f32.mrf.mxu1 }
 0x24b   : > { %v1589_v8 = vmul.f32 0.5, %v4419_v31  ;;  %2979 = vtanh.f32 %v1591_v25  ;;  %v1592_v20 = vmul.f32 0.5, %v4422_v61 }
 0x24c   : > { %v4425_v63 = vpop.f32.mrf.mxu0  ;;  %v4428_v50 = vpop.f32.mrf.mxu1 }
 0x24d   : > { %2981 = vtanh.f32 %v1589_v8  ;;  %v1590_v18 = vmul.f32 0.5, %v4425_v63  ;;  %v1595_v47 = vmul.f32 0.5, %v4428_v50 }
 0x24e   : > { %2983 = vtanh.f32 %v1592_v20  ;;  %v4431_v30 = vpop.f32.mrf.mxu0  ;;  %v4434_v46 = vpop.f32.mrf.mxu1 }
 0x24f   : > { %2985 = vtanh.f32 %v1590_v18  ;;  %v1593_v5 = vmul.f32 0.5, %v4431_v30  ;;  %v1596_v49 = vmul.f32 0.5, %v4434_v46 }
 0x250   : > { %2987 = vtanh.f32 %v1595_v47  ;;  %v4437_v10 = vpop.f32.mrf.mxu0  ;;  %v4440_v22 = vpop.f32.mrf.mxu1 }
 0x251   : > { %2989 = vtanh.f32 %v1593_v5  ;;  %v1594_v54 = vmul.f32 0.5, %v4437_v10  ;;  %v1599_v36 = vmul.f32 0.5, %v4440_v22 }
 0x252   : > { %2991 = vtanh.f32 %v1596_v49  ;;  %v4443_v45 = vpop.f32.mrf.mxu0  ;;  %v4446_v57 = vpop.f32.mrf.mxu1 }
 0x253   : > { %2993 = vtanh.f32 %v1594_v54  ;;  %v1597_v37 = vmul.f32 0.5, %v4443_v45  ;;  %v1600_v62 = vmul.f32 0.5, %v4446_v57 }
 0x254   : > { %2995 = vtanh.f32 %v1599_v36  ;;  %v4449_v40 = vpop.f32.mrf.mxu0  ;;  %v1584_v9 = vpop.f32.mrf.mxu1 }
 0x255   : > { %2997 = vtanh.f32 %v1597_v37  ;;  %v1598_v24 = vmul.f32 0.5, %v4449_v40  ;;  %v1603_v21 = vmul.f32 0.5, %v1584_v9 }
 0x256   : > { %2999 = vtanh.f32 %v1600_v62  ;;  %v4452_v55 = vpop.f32.mrf.mxu0  ;;  %v1586_v33 = vpop.f32.mrf.mxu1 }
 0x257   : > { %3001 = vtanh.f32 %v1598_v24  ;;  %v1601_v34 = vmul.f32 0.5, %v4452_v55  ;;  %v1604_v43 = vmul.f32 0.5, %v1586_v33 }
 0x258   : > { %3003 = vtanh.f32 %v1603_v21  ;;  %v1497_v0 = vpop.f32.mrf.mxu0  ;;  %v2980_v14 = vpop.eup %2979 }
 0x259   : > { %3005 = vtanh.f32 %v1601_v34  ;;  %v1602_v52 = vmul.f32 0.5, %v1497_v0  ;;  %v1623_v44 = vmul.f32 0.5, %v2980_v14 }
 0x25a   : > { %v2982_v32 = vpop.eup %2981  ;;  %3007 = vtanh.f32 %v1604_v43 }
 0x25b   : > { %v2984_v53 = vpop.eup %2983  ;;  %3009 = vtanh.f32 %v1602_v52  ;;  %v1621_v41 = vmul.f32 0.5, %v2982_v32 }
 0x25c   : > { %v2986_v35 = vpop.eup %2985  ;;  %v1624_v58 = vmul.f32 0.5, %v2984_v53 }
 0x25d   : > { %v2988_v27 = vpop.eup %2987  ;;  %v1622_v36 = vmul.f32 0.5, %v2986_v35 }
 0x25e   : > { %v2990_v39 = vpop.eup %2989  ;;  %v1627_v25 = vmul.f32 0.5, %v2988_v27  ;;  %v1640_v27 = vadd.f32 0.5, %v1624_v58 }
 0x25f   : > { %v2992_v26 = vpop.eup %2991  ;;  %v1625_v21 = vmul.f32 0.5, %v2990_v39 }
 0x260   : > { %v2994_v28 = vpop.eup %2993  ;;  %v1628_v23 = vmul.f32 0.5, %v2992_v26  ;;  %v1643_v52 = vadd.f32 0.5, %v1627_v25 }
 0x261   : > { %v2996_v4 = vpop.eup %2995  ;;  %v1626_v37 = vmul.f32 0.5, %v2994_v28 }
 0x262   : > { %v2998_v56 = vpop.eup %2997  ;;  %v1631_v13 = vmul.f32 0.5, %v2996_v4  ;;  %v1644_v34 = vadd.f32 0.5, %v1628_v23 }
 0x263   : > { %v3000_v51 = vpop.eup %2999  ;;  %v1629_v47 = vmul.f32 0.5, %v2998_v56 }
 0x264   : > { %v3002_v38 = vpop.eup %3001  ;;  %v1632_v48 = vmul.f32 0.5, %v3000_v51  ;;  %v1647_v62 = vadd.f32 0.5, %v1631_v13  ;;  %v1660_v39 = vmul.f32 %v1644_v34, %v4434_v46 }
 0x265   : > { %v3004_v7 = vpop.eup %3003  ;;  %v1630_v8 = vmul.f32 0.5, %v3002_v38  ;;  %v1645_v4 = vadd.f32 0.5, %v1629_v47  ;;  %v1639_v38 = vadd.f32 0.5, %v1623_v44 }
 0x266   : > { %v3006_v6 = vpop.eup %3005  ;;  %v1635_v11 = vmul.f32 0.5, %v3004_v7  ;;  %v1648_v5 = vadd.f32 0.5, %v1632_v48  ;;  %v1642_v48 = vadd.f32 0.5, %v1626_v37  ;;  %v1663_v35 = vmul.f32 %v1647_v62, %v4440_v22 }
 0x267   : > { %v3008_v42 = vpop.eup %3007  ;;  %v1633_v20 = vmul.f32 0.5, %v3006_v6  ;;  %v1646_v32 = vadd.f32 0.5, %v1630_v8  ;;  %v1641_v7 = vadd.f32 0.5, %v1625_v21  ;;  %v1638_v6 = vadd.f32 0.5, %v1622_v36 }
 0x268   : > { %v3010_v18 = vpop.eup %3009  ;;  %v1651_v49 = vadd.f32 0.5, %v1635_v11  ;;  %v1636_v54 = vmul.f32 0.5, %v3008_v42  ;;  %v1664_v51 = vmul.f32 %v1648_v5, %v4446_v57  ;;  %v1637_v57 = vadd.f32 0.5, %v1621_v41 }
 0x269   : > { %v1634_v24 = vmul.f32 0.5, %v3010_v18  ;;  %v1649_v43 = vadd.f32 0.5, %v1633_v20  ;;  %v1662_v23 = vmul.f32 %v1646_v32, %v4449_v40  ;;  %v1661_v44 = vmul.f32 %v1645_v4, %v4443_v45 }
 0x26a   : > { %v1652_v14 = vadd.f32 0.5, %v1636_v54  ;;  %v1667_v26 = vmul.f32 %v1651_v49, %v1584_v9  ;;  %v1659_v9 = vmul.f32 %v1643_v52, %v4428_v50  ;;  %v1655_v22 = vmul.f32 %v1639_v38, %v4416_v17 }
 0x26b   : > { %v1650_v53 = vadd.f32 0.5, %v1634_v24  ;;  %v1665_v13 = vmul.f32 %v1649_v43, %v4452_v55  ;;  %v1658_v46 = vmul.f32 %v1642_v48, %v4437_v10  ;;  %v1657_v55 = vmul.f32 %v1641_v7, %v4431_v30 }
 0x26c   : > { %v1668_v56 = vmul.f32 %v1652_v14, %v1586_v33  ;;  %v1656_v33 = vmul.f32 %v1640_v27, %v4422_v61  ;;  %v1654_v50 = vmul.f32 %v1638_v6, %v4425_v63  ;;  %v1653_v61 = vmul.f32 %v1637_v57, %v4419_v31 }
 0x26d   : > { %v1666_v28 = vmul.f32 %v1650_v53, %v1497_v0 }
 0x26e   : > { %1815 = vmatprep.subr.mxu1 %v1668_v56 }
 0x26f   : > { %1726 = vmatprep.subr.mxu0 %v1666_v28  ;;  %1816 = vmatpush1.msra.mxu1 %v1667_v26 }
 0x270   : > { %1727 = vmatpush1.msra.mxu0 %v1665_v13  ;;  %1817 = vmatprep.subr.mxu1 %v1664_v51 }
 0x271   : > { %1728 = vmatprep.subr.mxu0 %v1662_v23  ;;  %1818 = vmatpush1.msra.mxu1 %v1663_v35 }
 0x272   : > { %1729 = vmatpush1.msra.mxu0 %v1661_v44  ;;  %1819 = vmatprep.subr.mxu1 %v1660_v39 }
 0x273   : > { %1730 = vmatprep.subr.mxu0 %v1658_v46  ;;  %1820 = vmatpush1.msra.mxu1 %v1659_v9 }
 0x274   : > { %1731 = vmatpush1.msra.mxu0 %v1657_v55  ;;  %1821 = vmatprep.subr.mxu1 %v1656_v33 }
 0x275   : > { %1732 = vmatprep.subr.mxu0 %v1654_v50  ;;  %1822 = vmatpush1.msra.mxu1 %v1655_v22 }
 0x276   : > { %1733 = vmatpush1.msra.mxu0 %v1653_v61  ;;  %2860 = vmatmul.mubr.msk.f32.vlgmr.msra.gmra.mxu1 %vm1693_vm9, %v4401_v29 }
 0x277   : > { %2856 = vmatmul.mubr.msk.f32.vlgmr.msra.gmra.mxu0 %vm1693_vm9, %v4401_v29  ;;  %1861 = vmatprep.mubr.f32.mxu1 %v3140_v59  ;;  %v1686_v29 = vpop.permute.xlu1 %1685 }
 0x278   : > { %1772 = vmatprep.mubr.f32.mxu0 %v3140_v59 }
 0x27a   : > { %2861 = vmatmul.mubr.msk.f32.gmra.mxu1 %vm1693_vm9, %v4406_v2 }
 0x27b   : > { %2857 = vmatmul.mubr.msk.f32.gmra.mxu0 %vm1693_vm9, %v4406_v2  ;;  %1867 = vmatprep.mubr.f32.mxu1 %v3140_v59  ;;  %v1691_v2 = vpop.permute.xlu0 %1690  ;;  %v1676_v17 = vpop.permute.xlu1 %1675 }
 0x27c   : > { %1778 = vmatprep.mubr.f32.mxu0 %v3140_v59 }
 0x27e   : > { %2862 = vmatmul.mubr.msk.f32.gmra.mxu1 %vm1693_vm9, %v4389_v15 }
 0x27f   : > { %2858 = vmatmul.mubr.msk.f32.gmra.mxu0 %vm1693_vm9, %v4389_v15  ;;  %1873 = vmatprep.mubr.f32.mxu1 %v3140_v59  ;;  %v1681_v10 = vpop.permute.xlu0 %1680 }
 0x280   : > { %1784 = vmatprep.mubr.f32.mxu0 %v3140_v59 }
 0x282   : > { %2863 = vmatmul.mubr.msk.f32.gmra.mxu1 %vm1693_vm9, %v4394_v60 }
 0x283   : > { %2859 = vmatmul.mubr.msk.f32.gmra.mxu0 %vm1693_vm9, %v4394_v60  ;;  %2103 = vmatprep.mubr.f32.mxu1 %v3140_v59 }
 0x284   : > { %2032 = vmatprep.mubr.f32.mxu0 %v3140_v59 }
 0x336   : > { %v1857_v31 = vpop.f32.mrf.mxu1 }
 0x337   : > { %v4492_v63 = vadd.f32 %v1857_v31, %v1676_v17  ;;  %v1768_v15 = vpop.f32.mrf.mxu0 }
 0x338   : > { %v1859_v30 = vpop.f32.mrf.mxu1  ;;  %v4523_v27 = vadd.f32 %v1768_v15, %v1676_v17 }
 0x339   : > { %v1882_v45 = vmul.f32 0.5, %v4492_v63  ;;  %v4495_v40 = vadd.f32 %v1859_v30, %v1676_v17  ;;  %v1770_v0 = vpop.f32.mrf.mxu0 }
 0x33a   : > { %v4497_v41 = vadd.f32 %v1770_v0, %v1676_v17  ;;  %v1863_v60 = vpop.f32.mrf.mxu1  ;;  %v1880_v9 = vmul.f32 0.5, %v4523_v27 }
 0x33b   : > { %v1883_v11 = vmul.f32 0.5, %v4495_v40  ;;  %v4500_v59 = vadd.f32 %v1863_v60, %v1681_v10  ;;  %v1774_v42 = vpop.f32.mrf.mxu0  ;;  %3011 = vtanh.f32 %v1882_v45 }
 0x33c   : > { %v1881_v58 = vmul.f32 0.5, %v4497_v41  ;;  %v4503_v25 = vadd.f32 %v1774_v42, %v1681_v10  ;;  %v1865_v8 = vpop.f32.mrf.mxu1 }
 0x33d   : > { %3013 = vtanh.f32 %v1883_v11  ;;  %v1886_v20 = vmul.f32 0.5, %v4500_v59  ;;  %v4506_v18 = vadd.f32 %v1865_v8, %v1681_v10  ;;  %v1776_v47 = vpop.f32.mrf.mxu0 }
 0x33e   : > { %3015 = vtanh.f32 %v1881_v58  ;;  %v1884_v5 = vmul.f32 0.5, %v4503_v25  ;;  %v4509_v49 = vadd.f32 %v1776_v47, %v1681_v10  ;;  %v1869_v54 = vpop.f32.mrf.mxu1 }
 0x33f   : > { %3017 = vtanh.f32 %v1886_v20  ;;  %v1887_v36 = vmul.f32 0.5, %v4506_v18  ;;  %v4512_v37 = vadd.f32 %v1869_v54, %v1686_v29  ;;  %v1780_v62 = vpop.f32.mrf.mxu0 }
 0x340   : > { %3019 = vtanh.f32 %v1884_v5  ;;  %v1885_v24 = vmul.f32 0.5, %v4509_v49  ;;  %v4515_v21 = vadd.f32 %v1780_v62, %v1686_v29  ;;  %v1871_v34 = vpop.f32.mrf.mxu1 }
 0x341   : > { %3021 = vtanh.f32 %v1887_v36  ;;  %v1890_v43 = vmul.f32 0.5, %v4512_v37  ;;  %v4518_v14 = vadd.f32 %v1871_v34, %v1686_v29  ;;  %v1782_v52 = vpop.f32.mrf.mxu0 }
 0x342   : > { %3023 = vtanh.f32 %v1885_v24  ;;  %v1888_v32 = vmul.f32 0.5, %v4515_v21  ;;  %v4521_v26 = vadd.f32 %v1782_v52, %v1686_v29  ;;  %v1875_v53 = vpop.f32.mrf.mxu1 }
 0x343   : > { %3025 = vtanh.f32 %v1890_v43  ;;  %v1891_v4 = vmul.f32 0.5, %v4518_v14  ;;  %v4526_v51 = vadd.f32 %v1875_v53, %v1691_v2  ;;  %v1786_v56 = vpop.f32.mrf.mxu0 }
 0x344   : > { %3027 = vtanh.f32 %v1888_v32  ;;  %v1889_v38 = vmul.f32 0.5, %v4521_v26  ;;  %v4529_v48 = vadd.f32 %v1786_v56, %v1691_v2  ;;  %v1877_v35 = vpop.f32.mrf.mxu1 }
 0x345   : > { %3029 = vtanh.f32 %v1891_v4  ;;  %v1894_v28 = vmul.f32 0.5, %v4526_v51  ;;  %v1878_v7 = vadd.f32 %v1877_v35, %v1691_v2  ;;  %v1788_v39 = vpop.f32.mrf.mxu0 }
 0x346   : > { %3031 = vtanh.f32 %v1889_v38  ;;  %v1892_v13 = vmul.f32 0.5, %v4529_v48  ;;  %v1789_v6 = vadd.f32 %v1788_v39, %v1691_v2 }
 0x347   : > { %3033 = vtanh.f32 %v1894_v28  ;;  %v1895_v23 = vmul.f32 0.5, %v1878_v7 }
 0x348   : > { %3035 = vtanh.f32 %v1892_v13  ;;  %v1893_v57 = vmul.f32 0.5, %v1789_v6  ;;  %v3012_v33 = vpop.eup %3011 }
 0x349   : > { %3037 = vtanh.f32 %v1895_v23  ;;  %v1914_v58 = vmul.f32 0.5, %v3012_v33 }
 0x34a   : > { %v3014_v44 = vpop.eup %3013  ;;  %3039 = vtanh.f32 %v1893_v57 }
 0x34b   : > { %v3016_v22 = vpop.eup %3015  ;;  %3041 = vtanh.f32 %v1880_v9  ;;  %v1915_v20 = vmul.f32 0.5, %v3014_v44 }
 0x34c   : > { %v3018_v46 = vpop.eup %3017  ;;  %v1913_v56 = vmul.f32 0.5, %v3016_v22 }
 0x34d   : > { %v3020_v55 = vpop.eup %3019  ;;  %v1918_v43 = vmul.f32 0.5, %v3018_v46 }
 0x34e   : > { %v3022_v50 = vpop.eup %3021  ;;  %v1916_v52 = vmul.f32 0.5, %v3020_v55  ;;  %v1929_v22 = vadd.f32 0.5, %v1913_v56 }
 0x34f   : > { %v3024_v61 = vpop.eup %3023  ;;  %v1919_v47 = vmul.f32 0.5, %v3022_v50  ;;  %v1934_v50 = vadd.f32 0.5, %v1918_v43 }
 0x350   : > { %v3026_v29 = vpop.eup %3025  ;;  %v1917_v62 = vmul.f32 0.5, %v3024_v61  ;;  %v1931_v61 = vadd.f32 0.5, %v1915_v20 }
 0x351   : > { %v3028_v17 = vpop.eup %3027  ;;  %v1922_v60 = vmul.f32 0.5, %v3026_v29  ;;  %v1935_v13 = vadd.f32 0.5, %v1919_v47  ;;  %v1932_v29 = vadd.f32 0.5, %v1916_v52 }
 0x352   : > { %v3030_v31 = vpop.eup %3029  ;;  %v1920_v5 = vmul.f32 0.5, %v3028_v17  ;;  %v1933_v57 = vadd.f32 0.5, %v1917_v62  ;;  %v2112_v62 = vsub.f32 1.0, %v4355_v1 }
 0x353   : > { %v3032_v2 = vpop.eup %3031  ;;  %v1923_v10 = vmul.f32 0.5, %v3030_v31  ;;  %v1938_v38 = vadd.f32 0.5, %v1922_v60 }
 0x354   : > { %v3034_v15 = vpop.eup %3033  ;;  %v1921_v11 = vmul.f32 0.5, %v3032_v2  ;;  %v1936_v9 = vadd.f32 0.5, %v1920_v5 }
 0x355   : > { %v3036_v30 = vpop.eup %3035  ;;  %v1926_v45 = vmul.f32 0.5, %v3034_v15  ;;  %v1939_v32 = vadd.f32 0.5, %v1923_v10  ;;  %v1954_v17 = vmul.f32 %v1938_v38, %v4512_v37  ;;  %v1947_v37 = vmul.f32 %v1931_v61, %v4495_v40 }
 0x356   : > { %v3038_v0 = vpop.eup %3037  ;;  %v1924_v42 = vmul.f32 0.5, %v3036_v30  ;;  %v1937_v35 = vadd.f32 0.5, %v1921_v11  ;;  %v1945_v15 = vmul.f32 %v1929_v22, %v4497_v41  ;;  %v2110_v40 = vsub.f32 1.0, %v4358_v16 }
 0x357   : > { %v3040_v8 = vpop.eup %3039  ;;  %v1927_v54 = vmul.f32 0.5, %v3038_v0  ;;  %v1942_v24 = vadd.f32 0.5, %v1926_v45  ;;  %v1955_v46 = vmul.f32 %v1939_v32, %v4518_v14  ;;  %v1949_v14 = vmul.f32 %v1933_v57, %v4509_v49 }
 0x358   : > { %v3042_v36 = vpop.eup %3041  ;;  %v1925_v34 = vmul.f32 0.5, %v3040_v8  ;;  %v1940_v53 = vadd.f32 0.5, %v1924_v42  ;;  %v1953_v31 = vmul.f32 %v1937_v35, %v4521_v26  ;;  %v1948_v26 = vmul.f32 %v1932_v29, %v4503_v25  ;;  %v1964_v25 = vpop.permute.xlu0 %1963 }
 0x359   : > { %v1943_v4 = vadd.f32 0.5, %v1927_v54  ;;  %v1912_v39 = vmul.f32 0.5, %v3042_v36  ;;  %v1958_v33 = vmul.f32 %v1942_v24, %v4526_v51  ;;  %v1951_v51 = vmul.f32 %v1935_v13, %v4506_v18 }
 0x35a   : > { %v1941_v28 = vadd.f32 0.5, %v1925_v34  ;;  %v1956_v55 = vmul.f32 %v1940_v53, %v4529_v48  ;;  %v1950_v48 = vmul.f32 %v1934_v50, %v4500_v59  ;;  %v2111_v41 = vsub.f32 1.0, %v4348_v12 }
 0x35b   : > { %v1959_v23 = vmul.f32 %v1943_v4, %v1878_v7  ;;  %v1930_v7 = vadd.f32 0.5, %v1914_v58  ;;  %v1928_v2 = vadd.f32 0.5, %v1912_v39  ;;  %3043 = vrcp.f32 %v2110_v40 }
 0x35c   : > { %v1957_v44 = vmul.f32 %v1941_v28, %v1789_v6  ;;  %v1952_v6 = vmul.f32 %v1936_v9, %v4515_v21  ;;  %3045 = vrcp.f32 %v2111_v41  ;;  %v2113_v36 = vsub.f32 1.0, %v4346_v19 }
 0x35d   : > { %2063 = vmatprep.subr.mxu1 %v1959_v23  ;;  %v1946_v18 = vmul.f32 %v1930_v7, %v4492_v63  ;;  %v1944_v21 = vmul.f32 %v1928_v2, %v4523_v27  ;;  %v5006_v63 = vld [vmem:[#allocation3_spill] sm:$0xff] }
 0x35e   : > { %1992 = vmatprep.subr.mxu0 %v1957_v44  ;;  %2064 = vmatpush1.msra.mxu1 %v1958_v33  ;;  %v2120_v59 = vsub.s32 4, %v5006_v63  ;;  %3047 = vrcp.f32 %v2113_v36 }
 0x35f   : > { %1993 = vmatpush1.msra.mxu0 %v1956_v55  ;;  %2065 = vmatprep.subr.mxu1 %v1955_v46  ;;  %3049 = vrcp.f32 %v2112_v62 }
 0x360   : > { %1994 = vmatprep.subr.mxu0 %v1953_v31  ;;  %2066 = vmatpush1.msra.mxu1 %v1954_v17  ;;  %v2121_v30 = vrot.slane %v4358_v16, %v2120_v59  ;;  %v2125_v11 = vrot.slane %v4348_v12, %v2120_v59  ;;  %v2133_v52 = vrot.slane %v4346_v19, %v2120_v59 }
 0x361   : > { %1995 = vmatpush1.msra.mxu0 %v1952_v6  ;;  %2067 = vmatprep.subr.mxu1 %v1951_v51  ;;  %v2129_v32 = vrot.slane %v4355_v1, %v2120_v59 }
 0x362   : > { %1996 = vmatprep.subr.mxu0 %v1949_v14  ;;  %2068 = vmatpush1.msra.mxu1 %v1950_v48 }
 0x363   : > { %1997 = vmatpush1.msra.mxu0 %v1948_v26  ;;  %2069 = vmatprep.subr.mxu1 %v1947_v37 }
 0x364   : > { %1998 = vmatprep.subr.mxu0 %v1945_v15  ;;  %2070 = vmatpush1.msra.mxu1 %v1946_v18 }
 0x365   : > { %1999 = vmatpush1.msra.mxu0 %v1944_v21  ;;  %2865 = vmatmul.mubr.msk.f32.vlgmr.msra.gmra.mxu1 %vm1693_vm9, %v4413_v3 }
 0x366   : > { %2864 = vmatmul.mubr.msk.f32.vlgmr.msra.gmra.mxu0 %vm1693_vm9, %v4413_v3 }
 0x368   : > { %v3044_v10 = vpop.eup %3043 }
 0x369   : > { %v3046_v3 = vpop.eup %3045  ;;  %v2145_v58 = vrot.slane %v3044_v10, %v2120_v59 }
 0x36a   : > { %v2149_v5 = vrot.slane %v3046_v3, %v2120_v59 }
 0x36b   : > { %v3048_v4 = vpop.eup %3047 }
 0x36c   : > { %v3050_v38 = vpop.eup %3049  ;;  %v2157_v28 = vrot.slane %v3048_v4, %v2120_v59 }
 0x36d   : > { %v2153_v39 = vrot.slane %v3050_v38, %v2120_v59 }
 0x425   : > { %v2105_v24 = vpop.f32.mrf.mxu1 }
 0x426   : > { %v2034_v49 = vpop.f32.mrf.mxu0 }
 0x427   : > { %v2035_v27 = vadd.f32 %v2034_v49, %v1964_v25  ;;  %v2107_v34 = vpop.f32.mrf.mxu1 }
 0x428   : > { %v2036_v45 = vpop.f32.mrf.mxu0  ;;  %v2108_v43 = vadd.f32 %v2107_v34, %v1964_v25 }
 0x429   : > { %v2134_v0 = vmul.f32 %v2121_v30, %v2035_v27  ;;  %v2037_v60 = vadd.f32 %v2036_v45, %v1964_v25 }
 0x42b   : > { %v2138_v42 = vsub.f32 %v2134_v0, %v4358_v16  ;;  %v2135_v8 = vmul.f32 %v2125_v11, %v2037_v60  ;;  %v2106_v16 = vadd.f32 %v2105_v24, %v1964_v25 }
 0x42d   : > { %v2158_v20 = vmul.f32 %v2145_v58, %v2138_v42  ;;  %v2139_v47 = vsub.f32 %v2135_v8, %v4348_v12  ;;  %v2137_v12 = vmul.f32 %v2133_v52, %v2108_v43  ;;  %v2136_v53 = vmul.f32 %v2129_v32, %v2106_v16 }
 0x42f   : > { %v2159_v54 = vmul.f32 %v2149_v5, %v2139_v47  ;;  %2162 = vxpose.xlu1.b32.start.end [1/1] (short) %v2158_v20, 128  ;;  %v2141_v56 = vsub.f32 %v2137_v12, %v4346_v19  ;;  %v2140_v35 = vsub.f32 %v2136_v53, %v4355_v1 }
 0x431   : > { %2194 = vxpose.xlu0.b32.start.end [1/1] (short) %v2159_v54, 128  ;;  %v2161_v13 = vmul.f32 %v2157_v28, %v2141_v56  ;;  %v2160_v9 = vmul.f32 %v2153_v39, %v2140_v35 }
 0x46c   : > { %2258 = vxpose.xlu1.b32.start.end [1/1] (short) %v2161_v13, 128 }
 0x46e   : > { %2226 = vxpose.xlu0.b32.start.end [1/1] (short) %v2160_v9, 128 }
 0x4ab   : > { %v2178_v23 = vpop.trf.xlu1 }
 0x4ac   : > { %2290 = vst.msk [vmem:[%s4566_s16] sm:$0xff] %vm1123_vm0, %v2178_v23 }
 0x4ad   : > { %v2210_v19 = vpop.trf.xlu0 }
 0x4ae   : > { %2306 = vst.msk [vmem:[%s4566_s16 + $0x80] sm:$0xff] %vm1123_vm0, %v2210_v19 }
 0x4af   : > { %v2179_v1 = vpop.trf.xlu1 }
 0x4b0   : > { %2291 = vst.msk [vmem:[%s4566_s16 + $0x8] sm:$0xff] %vm1123_vm0, %v2179_v1 }
 0x4b1   : > { %v2211_v57 = vpop.trf.xlu0 }
 0x4b2   : > { %2307 = vst.msk [vmem:[%s4566_s16 + $0x88] sm:$0xff] %vm1123_vm0, %v2211_v57 }
 0x4b3   : > { %v2180_v33 = vpop.trf.xlu1 }
 0x4b4   : > { %2292 = vst.msk [vmem:[%s4566_s16 + $0x10] sm:$0xff] %vm1123_vm0, %v2180_v33 }
 0x4b5   : > { %v2212_v44 = vpop.trf.xlu0 }
 0x4b6   : > { %2308 = vst.msk [vmem:[%s4566_s16 + $0x90] sm:$0xff] %vm1123_vm0, %v2212_v44 }
 0x4b7   : > { %v2181_v50 = vpop.trf.xlu1 }
 0x4b8   : > { %2293 = vst.msk [vmem:[%s4566_s16 + $0x18] sm:$0xff] %vm1123_vm0, %v2181_v50 }
 0x4b9   : > { %v2213_v61 = vpop.trf.xlu0 }
 0x4ba   : > { %2309 = vst.msk [vmem:[%s4566_s16 + $0x98] sm:$0xff] %vm1123_vm0, %v2213_v61 }
 0x4bb   : > { %v2182_v29 = vpop.trf.xlu1 }
 0x4bc   : > { %2294 = vst.msk [vmem:[%s4566_s16 + $0x20] sm:$0xff] %vm1123_vm0, %v2182_v29 }
 0x4bd   : > { %v2214_v46 = vpop.trf.xlu0 }
 0x4be   : > { %2310 = vst.msk [vmem:[%s4566_s16 + $0xa0] sm:$0xff] %vm1123_vm0, %v2214_v46 }
 0x4bf   : > { %v2183_v55 = vpop.trf.xlu1 }
 0x4c0   : > { %2295 = vst.msk [vmem:[%s4566_s16 + $0x28] sm:$0xff] %vm1123_vm0, %v2183_v55 }
 0x4c1   : > { %v2215_v22 = vpop.trf.xlu0 }
 0x4c2   : > { %2311 = vst.msk [vmem:[%s4566_s16 + $0xa8] sm:$0xff] %vm1123_vm0, %v2215_v22 }
 0x4c3   : > { %v2184_v17 = vpop.trf.xlu1 }
 0x4c4   : > { %2296 = vst.msk [vmem:[%s4566_s16 + $0x30] sm:$0xff] %vm1123_vm0, %v2184_v17 }
 0x4c5   : > { %v2216_v31 = vpop.trf.xlu0 }
 0x4c6   : > { %2312 = vst.msk [vmem:[%s4566_s16 + $0xb0] sm:$0xff] %vm1123_vm0, %v2216_v31 }
 0x4c7   : > { %v2185_v7 = vpop.trf.xlu1 }
 0x4c8   : > { %2297 = vst.msk [vmem:[%s4566_s16 + $0x38] sm:$0xff] %vm1123_vm0, %v2185_v7 }
 0x4c9   : > { %v2217_v2 = vpop.trf.xlu0 }
 0x4ca   : > { %2313 = vst.msk [vmem:[%s4566_s16 + $0xb8] sm:$0xff] %vm1123_vm0, %v2217_v2 }
 0x4cb   : > { %v2186_v51 = vpop.trf.xlu1 }
 0x4cc   : > { %2298 = vst.msk [vmem:[%s4566_s16 + $0x40] sm:$0xff] %vm1123_vm0, %v2186_v51 }
 0x4cd   : > { %v2218_v6 = vpop.trf.xlu0 }
 0x4ce   : > { %2314 = vst.msk [vmem:[%s4566_s16 + $0xc0] sm:$0xff] %vm1123_vm0, %v2218_v6 }
 0x4cf   : > { %v2187_v14 = vpop.trf.xlu1 }
 0x4d0   : > { %2299 = vst.msk [vmem:[%s4566_s16 + $0x48] sm:$0xff] %vm1123_vm0, %v2187_v14 }
 0x4d1   : > { %v2219_v48 = vpop.trf.xlu0 }
 0x4d2   : > { %2315 = vst.msk [vmem:[%s4566_s16 + $0xc8] sm:$0xff] %vm1123_vm0, %v2219_v48 }
 0x4d3   : > { %v2188_v37 = vpop.trf.xlu1 }
 0x4d4   : > { %2300 = vst.msk [vmem:[%s4566_s16 + $0x50] sm:$0xff] %vm1123_vm0, %v2188_v37 }
 0x4d5   : > { %v2220_v26 = vpop.trf.xlu0 }
 0x4d6   : > { %2316 = vst.msk [vmem:[%s4566_s16 + $0xd0] sm:$0xff] %vm1123_vm0, %v2220_v26 }
 0x4d7   : > { %v2189_v15 = vpop.trf.xlu1 }
 0x4d8   : > { %2301 = vst.msk [vmem:[%s4566_s16 + $0x58] sm:$0xff] %vm1123_vm0, %v2189_v15 }
 0x4d9   : > { %v2221_v18 = vpop.trf.xlu0 }
 0x4da   : > { %2317 = vst.msk [vmem:[%s4566_s16 + $0xd8] sm:$0xff] %vm1123_vm0, %v2221_v18 }
 0x4db   : > { %v2190_v21 = vpop.trf.xlu1 }
 0x4dc   : > { %2302 = vst.msk [vmem:[%s4566_s16 + $0x60] sm:$0xff] %vm1123_vm0, %v2190_v21 }
 0x4dd   : > { %v2222_v40 = vpop.trf.xlu0 }
 0x4de   : > { %2318 = vst.msk [vmem:[%s4566_s16 + $0xe0] sm:$0xff] %vm1123_vm0, %v2222_v40 }
 0x4df   : > { %v2191_v41 = vpop.trf.xlu1 }
 0x4e0   : > { %2303 = vst.msk [vmem:[%s4566_s16 + $0x68] sm:$0xff] %vm1123_vm0, %v2191_v41 }
 0x4e1   : > { %v2223_v63 = vpop.trf.xlu0 }
 0x4e2   : > { %2319 = vst.msk [vmem:[%s4566_s16 + $0xe8] sm:$0xff] %vm1123_vm0, %v2223_v63 }
 0x4e3   : > { %v2192_v59 = vpop.trf.xlu1 }
 0x4e4   : > { %2304 = vst.msk [vmem:[%s4566_s16 + $0x70] sm:$0xff] %vm1123_vm0, %v2192_v59 }
 0x4e5   : > { %v2224_v25 = vpop.trf.xlu0 }
 0x4e6   : > { %2320 = vst.msk [vmem:[%s4566_s16 + $0xf0] sm:$0xff] %vm1123_vm0, %v2224_v25 }
 0x4e7   : > { %v2193_v49 = vpop.trf.xlu1 }
 0x4e8   : > { %2305 = vst.msk [vmem:[%s4566_s16 + $0x78] sm:$0xff] %vm1123_vm0, %v2193_v49 }
 0x4e9   : > { %v2225_v27 = vpop.trf.xlu0 }
 0x4ea   : > { %2321 = vst.msk [vmem:[%s4566_s16 + $0xf8] sm:$0xff] %vm1123_vm0, %v2225_v27 }
 0x4eb   : > { %v2274_v30 = vpop.trf.xlu1 }
 0x4ec   : > { %2338 = vst.msk [vmem:[%s4566_s16 + $0x180] sm:$0xff] %vm1123_vm0, %v2274_v30 }
 0x4ed   : > { %v2242_v10 = vpop.trf.xlu0 }
 0x4ee   : > { %2322 = vst.msk [vmem:[%s4566_s16 + $0x100] sm:$0xff] %vm1123_vm0, %v2242_v10 }
 0x4ef   : > { %v2275_v45 = vpop.trf.xlu1 }
 0x4f0   : > { %2339 = vst.msk [vmem:[%s4566_s16 + $0x188] sm:$0xff] %vm1123_vm0, %v2275_v45 }
 0x4f1   : > { %v2243_v0 = vpop.trf.xlu0 }
 0x4f2   : > { %2323 = vst.msk [vmem:[%s4566_s16 + $0x108] sm:$0xff] %vm1123_vm0, %v2243_v0 }
 0x4f3   : > { %v2276_v60 = vpop.trf.xlu1 }
 0x4f4   : > { %2340 = vst.msk [vmem:[%s4566_s16 + $0x190] sm:$0xff] %vm1123_vm0, %v2276_v60 }
 0x4f5   : > { %v2244_v11 = vpop.trf.xlu0 }
 0x4f6   : > { %2324 = vst.msk [vmem:[%s4566_s16 + $0x110] sm:$0xff] %vm1123_vm0, %v2244_v11 }
 0x4f7   : > { %v2277_v3 = vpop.trf.xlu1 }
 0x4f8   : > { %2341 = vst.msk [vmem:[%s4566_s16 + $0x198] sm:$0xff] %vm1123_vm0, %v2277_v3 }
 0x4f9   : > { %v2245_v42 = vpop.trf.xlu0 }
 0x4fa   : > { %2325 = vst.msk [vmem:[%s4566_s16 + $0x118] sm:$0xff] %vm1123_vm0, %v2245_v42 }
 0x4fb   : > { %v2278_v58 = vpop.trf.xlu1 }
 0x4fc   : > { %2342 = vst.msk [vmem:[%s4566_s16 + $0x1a0] sm:$0xff] %vm1123_vm0, %v2278_v58 }
 0x4fd   : > { %v2246_v8 = vpop.trf.xlu0 }
 0x4fe   : > { %2326 = vst.msk [vmem:[%s4566_s16 + $0x120] sm:$0xff] %vm1123_vm0, %v2246_v8 }
 0x4ff   : > { %v2279_v20 = vpop.trf.xlu1 }
 0x500   : > { %2343 = vst.msk [vmem:[%s4566_s16 + $0x1a8] sm:$0xff] %vm1123_vm0, %v2279_v20 }
 0x501   : > { %v2247_v47 = vpop.trf.xlu0 }
 0x502   : > { %2327 = vst.msk [vmem:[%s4566_s16 + $0x128] sm:$0xff] %vm1123_vm0, %v2247_v47 }
 0x503   : > { %v2280_v5 = vpop.trf.xlu1 }
 0x504   : > { %2344 = vst.msk [vmem:[%s4566_s16 + $0x1b0] sm:$0xff] %vm1123_vm0, %v2280_v5 }
 0x505   : > { %v2248_v54 = vpop.trf.xlu0 }
 0x506   : > { %2328 = vst.msk [vmem:[%s4566_s16 + $0x130] sm:$0xff] %vm1123_vm0, %v2248_v54 }
 0x507   : > { %v2281_v36 = vpop.trf.xlu1 }
 0x508   : > { %2345 = vst.msk [vmem:[%s4566_s16 + $0x1b8] sm:$0xff] %vm1123_vm0, %v2281_v36 }
 0x509   : > { %v2249_v62 = vpop.trf.xlu0 }
 0x50a   : > { %2329 = vst.msk [vmem:[%s4566_s16 + $0x138] sm:$0xff] %vm1123_vm0, %v2249_v62 }
 0x50b   : > { %v2282_v24 = vpop.trf.xlu1 }
 0x50c   : > { %2346 = vst.msk [vmem:[%s4566_s16 + $0x1c0] sm:$0xff] %vm1123_vm0, %v2282_v24 }
 0x50d   : > { %v2250_v34 = vpop.trf.xlu0 }
 0x50e   : > { %2330 = vst.msk [vmem:[%s4566_s16 + $0x140] sm:$0xff] %vm1123_vm0, %v2250_v34 }
 0x50f   : > { %v2283_v43 = vpop.trf.xlu1 }
 0x510   : > { %2347 = vst.msk [vmem:[%s4566_s16 + $0x1c8] sm:$0xff] %vm1123_vm0, %v2283_v43 }
 0x511   : > { %v2251_v16 = vpop.trf.xlu0 }
 0x512   : > { %2331 = vst.msk [vmem:[%s4566_s16 + $0x148] sm:$0xff] %vm1123_vm0, %v2251_v16 }
 0x513   : > { %v2284_v52 = vpop.trf.xlu1 }
 0x514   : > { %2348 = vst.msk [vmem:[%s4566_s16 + $0x1d0] sm:$0xff] %vm1123_vm0, %v2284_v52 }
 0x515   : > { %v2252_v32 = vpop.trf.xlu0 }
 0x516   : > { %2332 = vst.msk [vmem:[%s4566_s16 + $0x150] sm:$0xff] %vm1123_vm0, %v2252_v32 }
 0x517   : > { %v2285_v12 = vpop.trf.xlu1 }
 0x518   : > { %2349 = vst.msk [vmem:[%s4566_s16 + $0x1d8] sm:$0xff] %vm1123_vm0, %v2285_v12 }
 0x519   : > { %v2253_v53 = vpop.trf.xlu0 }
 0x51a   : > { %2333 = vst.msk [vmem:[%s4566_s16 + $0x158] sm:$0xff] %vm1123_vm0, %v2253_v53 }
 0x51b   : > { %v2286_v4 = vpop.trf.xlu1 }
 0x51c   : > { %2350 = vst.msk [vmem:[%s4566_s16 + $0x1e0] sm:$0xff] %vm1123_vm0, %v2286_v4 }
 0x51d   : > { %v2254_v56 = vpop.trf.xlu0 }
 0x51e   : > { %2334 = vst.msk [vmem:[%s4566_s16 + $0x160] sm:$0xff] %vm1123_vm0, %v2254_v56 }
 0x51f   : > { %v2287_v38 = vpop.trf.xlu1 }
 0x520   : > { %2351 = vst.msk [vmem:[%s4566_s16 + $0x1e8] sm:$0xff] %vm1123_vm0, %v2287_v38 }
 0x521   : > { %v2255_v35 = vpop.trf.xlu0 }
 0x522   : > { %2335 = vst.msk [vmem:[%s4566_s16 + $0x168] sm:$0xff] %vm1123_vm0, %v2255_v35 }
 0x523   : > { %v2288_v28 = vpop.trf.xlu1 }
 0x524   : > { %2352 = vst.msk [vmem:[%s4566_s16 + $0x1f0] sm:$0xff] %vm1123_vm0, %v2288_v28 }
 0x525   : > { %v2256_v39 = vpop.trf.xlu0 }
 0x526   : > { %2336 = vst.msk [vmem:[%s4566_s16 + $0x170] sm:$0xff] %vm1123_vm0, %v2256_v39  ;;  %2360 = sbr.rel (!%p3197_p4) target bundleno = 1387 (0x56b), region = 44 }
 0x527   : > { %v2289_v13 = vpop.trf.xlu1 }
 0x528   : > { %2353 = vst.msk [vmem:[%s4566_s16 + $0x1f8] sm:$0xff] %vm1123_vm0, %v2289_v13 }
 0x529   : > { %v2257_v9 = vpop.trf.xlu0 }
 0x52a   : > { %2337 = vst.msk [vmem:[%s4566_s16 + $0x178] sm:$0xff] %vm1123_vm0, %v2257_v9 }
 0x52b   : > { %s5016_s18 = smov (!%p2363_p8, %s2362_s18), 64 }
 0x52c   : > { %s2868_s24 = sshll.u32 %s5016_s18, 7 }
 0x52d   : > { %p2871_p9 = scmp.eq.s32.totalorder %s2868_s24, 0 }
 0x52e   : > { %s4710_s29 = sshrl.u32 (!%p2871_p9), %s5016_s18, 6 }
 0x52f   : > { %2371 = sbr.rel (%p2871_p9) target bundleno = 1387 (0x56b), region = 48  ;;  %p2872_p10 = scmp.le.s32.totalorder (!%p2871_p9), %s4710_s29, 0 }
 0x534   : > { %2784 = sbr.rel (%p2872_p10) target bundleno = 1370 (0x55a), region = 127  ;;  %s5007_s21 = smov (!%p2872_p10), %s4704_s23 }
 0x535   : > { %s5008_s26 = smov (!%p2872_p10), %s4566_s16  ;;  %s4719_s27 = smov (!%p2872_p10), 0  }
 0x536   : > { %s4721_s28 = smov (!%p2872_p10), 0  }
 0x539 LB: >> { %v2560_v23 = vld [vmem:[%s3113_s26] sm:$0xff]  ;;  %v2562_v19 = vld [vmem:[%s3113_s26 + $0x8] sm:$0xff]  ;;  %v2564_v1 = vld [vmem:[%s3113_s26 + $0x10] sm:$0xff]  ;;  %s2688_s30 = sadd.s32 1, %s3117_s27  ;;  %s2554_s28 = sadd.s32 1, %s3121_s28   ;;  %s3121_s28 = sphi %s4721_s28, %s2554_s28   ;;  %s3117_s27 = sphi %s4719_s27, %s5011_s27   ;;  %s3113_s26 = sphi %s5008_s26, %s5010_s26   ;;  %s3109_s21 = sphi %s5007_s21, %s5009_s21  }
 0x53a   : >> { %2561 = vst [vmem:[%s3109_s21] sm:$0xff] %v2560_v23  ;;  %2563 = vst [vmem:[%s3109_s21 + $0x8] sm:$0xff] %v2562_v19  ;;  %v2566_v57 = vld [vmem:[%s3113_s26 + $0x18] sm:$0xff]  ;;  %v2568_v33 = vld [vmem:[%s3113_s26 + $0x20] sm:$0xff]  ;;  %p2689_p11 = scmp.ge.s32.totalorder %s2688_s30, %s4710_s29  ;;  %p2553_p12 = scmp.ge.s32.totalorder %s2554_s28, %s4710_s29 }
 0x53b   : >> { %2565 = vst [vmem:[%s3109_s21 + $0x10] sm:$0xff] %v2564_v1  ;;  %v2570_v44 = vld [vmem:[%s3113_s26 + $0x28] sm:$0xff]  ;;  %2567 = vst [vmem:[%s3109_s21 + $0x18] sm:$0xff] %v2566_v57  ;;  %v2572_v50 = vld [vmem:[%s3113_s26 + $0x30] sm:$0xff] }
 0x53c   : >> { %2569 = vst [vmem:[%s3109_s21 + $0x20] sm:$0xff] %v2568_v33  ;;  %2571 = vst [vmem:[%s3109_s21 + $0x28] sm:$0xff] %v2570_v44  ;;  %v2574_v61 = vld [vmem:[%s3113_s26 + $0x38] sm:$0xff]  ;;  %v2576_v29 = vld [vmem:[%s3113_s26 + $0x40] sm:$0xff]  ;;  %s5018_s30 = smov (%p2689_p11, %s2688_s30), 0 }
 0x53d   : >> { %2573 = vst [vmem:[%s3109_s21 + $0x30] sm:$0xff] %v2572_v50  ;;  %2575 = vst [vmem:[%s3109_s21 + $0x38] sm:$0xff] %v2574_v61  ;;  %v2578_v46 = vld [vmem:[%s3113_s26 + $0x48] sm:$0xff]  ;;  %v2580_v55 = vld [vmem:[%s3113_s26 + $0x50] sm:$0xff]  ;;  %s2873_s6 = sshll.u32 %s5018_s30, 9  ;;  %s5011_s27 = smov %s5018_s30 }
 0x53e   : >> { %2577 = vst [vmem:[%s3109_s21 + $0x40] sm:$0xff] %v2576_v29  ;;  %v2582_v22 = vld [vmem:[%s3113_s26 + $0x58] sm:$0xff]  ;;  %2579 = vst [vmem:[%s3109_s21 + $0x48] sm:$0xff] %v2578_v46  ;;  %v2584_v17 = vld [vmem:[%s3113_s26 + $0x60] sm:$0xff]  ;;  %s4777_s7 = scalar_lea.vmem %s4566_s16, %s2873_s6 [#allocation2]   ;;  %s4780_s8 = scalar_lea.vmem %s4704_s23, %s2873_s6  }
 0x53f   : >> { %2581 = vst [vmem:[%s3109_s21 + $0x50] sm:$0xff] %v2580_v55  ;;  %2583 = vst [vmem:[%s3109_s21 + $0x58] sm:$0xff] %v2582_v22  ;;  %v2586_v31 = vld [vmem:[%s3113_s26 + $0x68] sm:$0xff]  ;;  %v2588_v7 = vld [vmem:[%s3113_s26 + $0x70] sm:$0xff] }
 0x540   : >> { %2585 = vst [vmem:[%s3109_s21 + $0x60] sm:$0xff] %v2584_v17  ;;  %2587 = vst [vmem:[%s3109_s21 + $0x68] sm:$0xff] %v2586_v31  ;;  %v2590_v2 = vld [vmem:[%s3113_s26 + $0x78] sm:$0xff]  ;;  %v2592_v51 = vld [vmem:[%s3113_s26 + $0x80] sm:$0xff] }
 0x541   : >> { %2589 = vst [vmem:[%s3109_s21 + $0x70] sm:$0xff] %v2588_v7  ;;  %v2594_v6 = vld [vmem:[%s3113_s26 + $0x88] sm:$0xff]  ;;  %2591 = vst [vmem:[%s3109_s21 + $0x78] sm:$0xff] %v2590_v2  ;;  %v2596_v14 = vld [vmem:[%s3113_s26 + $0x90] sm:$0xff] }
 0x542   : >> { %2593 = vst [vmem:[%s3109_s21 + $0x80] sm:$0xff] %v2592_v51  ;;  %2595 = vst [vmem:[%s3109_s21 + $0x88] sm:$0xff] %v2594_v6  ;;  %v2598_v48 = vld [vmem:[%s3113_s26 + $0x98] sm:$0xff]  ;;  %v2600_v37 = vld [vmem:[%s3113_s26 + $0xa0] sm:$0xff] }
 0x543   : >> { %2597 = vst [vmem:[%s3109_s21 + $0x90] sm:$0xff] %v2596_v14  ;;  %2599 = vst [vmem:[%s3109_s21 + $0x98] sm:$0xff] %v2598_v48  ;;  %v2602_v26 = vld [vmem:[%s3113_s26 + $0xa8] sm:$0xff]  ;;  %v2604_v15 = vld [vmem:[%s3113_s26 + $0xb0] sm:$0xff] }
 0x544   : >> { %2601 = vst [vmem:[%s3109_s21 + $0xa0] sm:$0xff] %v2600_v37  ;;  %v2606_v18 = vld [vmem:[%s3113_s26 + $0xb8] sm:$0xff]  ;;  %2603 = vst [vmem:[%s3109_s21 + $0xa8] sm:$0xff] %v2602_v26  ;;  %v2608_v21 = vld [vmem:[%s3113_s26 + $0xc0] sm:$0xff] }
 0x545   : >> { %2605 = vst [vmem:[%s3109_s21 + $0xb0] sm:$0xff] %v2604_v15  ;;  %2607 = vst [vmem:[%s3109_s21 + $0xb8] sm:$0xff] %v2606_v18  ;;  %v2610_v40 = vld [vmem:[%s3113_s26 + $0xc8] sm:$0xff]  ;;  %v2612_v41 = vld [vmem:[%s3113_s26 + $0xd0] sm:$0xff] }
 0x546   : >> { %2609 = vst [vmem:[%s3109_s21 + $0xc0] sm:$0xff] %v2608_v21  ;;  %2611 = vst [vmem:[%s3109_s21 + $0xc8] sm:$0xff] %v2610_v40  ;;  %v2614_v63 = vld [vmem:[%s3113_s26 + $0xd8] sm:$0xff]  ;;  %v2616_v59 = vld [vmem:[%s3113_s26 + $0xe0] sm:$0xff] }
 0x547   : >> { %2613 = vst [vmem:[%s3109_s21 + $0xd0] sm:$0xff] %v2612_v41  ;;  %v2618_v25 = vld [vmem:[%s3113_s26 + $0xe8] sm:$0xff]  ;;  %2615 = vst [vmem:[%s3109_s21 + $0xd8] sm:$0xff] %v2614_v63  ;;  %v2620_v49 = vld [vmem:[%s3113_s26 + $0xf0] sm:$0xff] }
 0x548   : >> { %2617 = vst [vmem:[%s3109_s21 + $0xe0] sm:$0xff] %v2616_v59  ;;  %2619 = vst [vmem:[%s3109_s21 + $0xe8] sm:$0xff] %v2618_v25  ;;  %v2622_v27 = vld [vmem:[%s3113_s26 + $0xf8] sm:$0xff]  ;;  %v2624_v30 = vld [vmem:[%s3113_s26 + $0x100] sm:$0xff] }
 0x549   : >> { %2621 = vst [vmem:[%s3109_s21 + $0xf0] sm:$0xff] %v2620_v49  ;;  %2623 = vst [vmem:[%s3109_s21 + $0xf8] sm:$0xff] %v2622_v27  ;;  %v2626_v10 = vld [vmem:[%s3113_s26 + $0x108] sm:$0xff]  ;;  %v2628_v45 = vld [vmem:[%s3113_s26 + $0x110] sm:$0xff] }
 0x54a   : >> { %2625 = vst [vmem:[%s3109_s21 + $0x100] sm:$0xff] %v2624_v30  ;;  %v2630_v0 = vld [vmem:[%s3113_s26 + $0x118] sm:$0xff]  ;;  %2627 = vst [vmem:[%s3109_s21 + $0x108] sm:$0xff] %v2626_v10  ;;  %v2632_v60 = vld [vmem:[%s3113_s26 + $0x120] sm:$0xff] }
 0x54b   : >> { %2629 = vst [vmem:[%s3109_s21 + $0x110] sm:$0xff] %v2628_v45  ;;  %2631 = vst [vmem:[%s3109_s21 + $0x118] sm:$0xff] %v2630_v0  ;;  %v2634_v11 = vld [vmem:[%s3113_s26 + $0x128] sm:$0xff]  ;;  %v2636_v3 = vld [vmem:[%s3113_s26 + $0x130] sm:$0xff] }
 0x54c   : >> { %2633 = vst [vmem:[%s3109_s21 + $0x120] sm:$0xff] %v2632_v60  ;;  %2635 = vst [vmem:[%s3109_s21 + $0x128] sm:$0xff] %v2634_v11  ;;  %v2638_v42 = vld [vmem:[%s3113_s26 + $0x138] sm:$0xff]  ;;  %v2640_v58 = vld [vmem:[%s3113_s26 + $0x140] sm:$0xff] }
 0x54d   : >> { %2637 = vst [vmem:[%s3109_s21 + $0x130] sm:$0xff] %v2636_v3  ;;  %v2642_v8 = vld [vmem:[%s3113_s26 + $0x148] sm:$0xff]  ;;  %2639 = vst [vmem:[%s3109_s21 + $0x138] sm:$0xff] %v2638_v42  ;;  %v2644_v20 = vld [vmem:[%s3113_s26 + $0x150] sm:$0xff] }
 0x54e   : >> { %2641 = vst [vmem:[%s3109_s21 + $0x140] sm:$0xff] %v2640_v58  ;;  %2643 = vst [vmem:[%s3109_s21 + $0x148] sm:$0xff] %v2642_v8  ;;  %v2646_v47 = vld [vmem:[%s3113_s26 + $0x158] sm:$0xff]  ;;  %v2648_v5 = vld [vmem:[%s3113_s26 + $0x160] sm:$0xff] }
 0x54f   : >> { %2645 = vst [vmem:[%s3109_s21 + $0x150] sm:$0xff] %v2644_v20  ;;  %2647 = vst [vmem:[%s3109_s21 + $0x158] sm:$0xff] %v2646_v47  ;;  %v2650_v54 = vld [vmem:[%s3113_s26 + $0x168] sm:$0xff]  ;;  %v2652_v36 = vld [vmem:[%s3113_s26 + $0x170] sm:$0xff] }
 0x550   : >> { %2649 = vst [vmem:[%s3109_s21 + $0x160] sm:$0xff] %v2648_v5  ;;  %v2654_v62 = vld [vmem:[%s3113_s26 + $0x178] sm:$0xff]  ;;  %2651 = vst [vmem:[%s3109_s21 + $0x168] sm:$0xff] %v2650_v54  ;;  %v2656_v24 = vld [vmem:[%s3113_s26 + $0x180] sm:$0xff] }
 0x551   : >> { %2653 = vst [vmem:[%s3109_s21 + $0x170] sm:$0xff] %v2652_v36  ;;  %2655 = vst [vmem:[%s3109_s21 + $0x178] sm:$0xff] %v2654_v62  ;;  %v2658_v34 = vld [vmem:[%s3113_s26 + $0x188] sm:$0xff]  ;;  %v2660_v43 = vld [vmem:[%s3113_s26 + $0x190] sm:$0xff] }
 0x552   : >> { %2657 = vst [vmem:[%s3109_s21 + $0x180] sm:$0xff] %v2656_v24  ;;  %2659 = vst [vmem:[%s3109_s21 + $0x188] sm:$0xff] %v2658_v34  ;;  %v2662_v16 = vld [vmem:[%s3113_s26 + $0x198] sm:$0xff]  ;;  %v2664_v52 = vld [vmem:[%s3113_s26 + $0x1a0] sm:$0xff] }
 0x553   : >> { %2661 = vst [vmem:[%s3109_s21 + $0x190] sm:$0xff] %v2660_v43  ;;  %v2666_v32 = vld [vmem:[%s3113_s26 + $0x1a8] sm:$0xff]  ;;  %2663 = vst [vmem:[%s3109_s21 + $0x198] sm:$0xff] %v2662_v16  ;;  %v2668_v12 = vld [vmem:[%s3113_s26 + $0x1b0] sm:$0xff] }
 0x554   : >> { %2665 = vst [vmem:[%s3109_s21 + $0x1a0] sm:$0xff] %v2664_v52  ;;  %2667 = vst [vmem:[%s3109_s21 + $0x1a8] sm:$0xff] %v2666_v32  ;;  %v2670_v53 = vld [vmem:[%s3113_s26 + $0x1b8] sm:$0xff]  ;;  %v2672_v4 = vld [vmem:[%s3113_s26 + $0x1c0] sm:$0xff] }
 0x555   : >> { %2669 = vst [vmem:[%s3109_s21 + $0x1b0] sm:$0xff] %v2668_v12  ;;  %2671 = vst [vmem:[%s3109_s21 + $0x1b8] sm:$0xff] %v2670_v53  ;;  %v2674_v56 = vld [vmem:[%s3113_s26 + $0x1c8] sm:$0xff]  ;;  %v2676_v38 = vld [vmem:[%s3113_s26 + $0x1d0] sm:$0xff]  ;;  %2556 = sbr.rel (!%p2553_p12) target bundleno = 1337 (0x539), region = 133 }
 0x556   : >> { %2673 = vst [vmem:[%s3109_s21 + $0x1c0] sm:$0xff] %v2672_v4  ;;  %v2678_v35 = vld [vmem:[%s3113_s26 + $0x1d8] sm:$0xff]  ;;  %2675 = vst [vmem:[%s3109_s21 + $0x1c8] sm:$0xff] %v2674_v56  ;;  %v2680_v28 = vld [vmem:[%s3113_s26 + $0x1e0] sm:$0xff] }
 0x557   : >> { %2677 = vst [vmem:[%s3109_s21 + $0x1d0] sm:$0xff] %v2676_v38  ;;  %2679 = vst [vmem:[%s3109_s21 + $0x1d8] sm:$0xff] %v2678_v35  ;;  %v2682_v39 = vld [vmem:[%s3113_s26 + $0x1e8] sm:$0xff]  ;;  %v2684_v13 = vld [vmem:[%s3113_s26 + $0x1f0] sm:$0xff] }
 0x558   : >> { %2681 = vst [vmem:[%s3109_s21 + $0x1e0] sm:$0xff] %v2680_v28  ;;  %2683 = vst [vmem:[%s3109_s21 + $0x1e8] sm:$0xff] %v2682_v39  ;;  %v2686_v9 = vld [vmem:[%s3113_s26 + $0x1f8] sm:$0xff]  ;;  %s5010_s26 = smov %s4777_s7 }
 0x559   : >> { %2685 = vst [vmem:[%s3109_s21 + $0x1f0] sm:$0xff] %v2684_v13  ;;  %2687 = vst [vmem:[%s3109_s21 + $0x1f8] sm:$0xff] %v2686_v9  ;;  %s5009_s21 = smov %s4780_s8 }
 0x55a PF: > { %s4885_s9 = sand.u32 63, %s5016_s18   ;;  %s2884_s10 = sshll.u32 %s4710_s29, 9 }
 0x55b   : > { %s2699_s11 = scalar_lea.vmem %s4566_s16, %s2884_s10 [#allocation2]   ;;  %s2701_s12 = scalar_lea.vmem %s4704_s23, %s2884_s10  }
 0x55c   : > { %p2878_p13 = scmp.le.s32.totalorder %s4885_s9, 0 }
 0x55d   : > { %s3123_s13 = smov (!%p2878_p13), %s2701_s12   ;;  %s3127_s14 = smov (!%p2878_p13), %s2699_s11  }
 0x55e   : > { %2798 = sbr.rel (%p2878_p13) target bundleno = 1387 (0x56b), region = 138  ;;  %s3131_s15 = smov (!%p2878_p13), 0  }
 0x55f   : > { %s3135_s17 = smov (!%p2878_p13), 0  }
 0x563 LB: >> { %v2711_v23 = vld [vmem:[%s3129_s14] sm:$0xff]  ;;  %s2713_s18 = sadd.s32 1, %s3133_s15  ;;  %s2705_s17 = sadd.s32 1, %s3137_s17   ;;  %s3137_s17 = sphi %s3135_s17, %s2705_s17   ;;  %s3133_s15 = sphi %s3131_s15, %s3132_s15   ;;  %s3129_s14 = sphi %s3127_s14, %s2718_s14   ;;  %s3125_s13 = sphi %s3123_s13, %s2719_s13  }
 0x564   : >> { %2712 = vst [vmem:[%s3125_s13] sm:$0xff] %v2711_v23  ;;  %p2714_p0 = scmp.ge.s32.totalorder %s2713_s18, %s4885_s9  ;;  %p2704_p1 = scmp.ge.s32.totalorder %s2705_s17, %s4885_s9 }
 0x566   : >> { %s5020_s18 = smov (%p2714_p0, %s2713_s18), 0  ;;  %2707 = sbr.rel (!%p2704_p1) target bundleno = 1379 (0x563), region = 144 }
 0x567   : >> { %s2879_s16 = sshll.u32 %s5020_s18, 3  ;;  %s3132_s15 = smov %s5020_s18  }
 0x568   : >> { %s2718_s14 = scalar_lea.vmem %s2699_s11, %s2879_s16 [#allocation2]   ;;  %s2719_s13 = scalar_lea.vmem %s2701_s12, %s2879_s16  }
 0x56b PF: > { %p12_p2 = scmp.ge.s32.totalorder %s3187_s22, 4   ;;  %s5012_s18 = smov %s3101_s19 }
 0x56c   : > { %s5013_s19 = smov %s3195_s25  ;;  %s5014_s20 = smov %s3187_s22 }
 0x56d   :  { %14 = sbr.rel (!%p12_p2) target bundleno = 2 (0x2), region = 155 }

</bundles_post_ra>
